<compile_context>
chip_gen: v6e
topology: v6e:2x2x1
jax: 0.10.0
libtpu: 0.0.40
codegen_flags: <defaults>
</compile_context>

<pallas_src>
import functools
import math

import jax
import jax.numpy as jnp
from jax.experimental import pallas as pl
from jax.experimental.pallas import tpu as pltpu

_SQRT_2_OVER_PI = 0.7978845608028654   # sqrt(2/pi), tanh-approx GELU
_INV_SQRT_2 = 0.7071067811865476       # 1/sqrt(2), exact (erf) GELU
_LN_EPS = 1e-5


def _device_kind():
    try:
        return jax.devices()[0].device_kind.lower()
    except Exception:
        return ""


_IS_V7 = "v7" in _device_kind()
# v5e/v6e have 128 MiB physical VMEM -> larger tiles / higher scoped limit.
# v7x has only 64 MiB -> smaller budget, and the >=2-step parallel grid below
# keeps both of its TensorCores busy.
_VMEM_LIMIT = (48 if _IS_V7 else 96) * 1024 * 1024
_DEFAULT_ROW_TILE = 256 if _IS_V7 else 512


def _round_up(n, m):
    return ((n + m - 1) // m) * m


def _pick_row_tile(rows, requested):
    # Multiple-of-16 sublane tiles (safe for bf16 packing), capped at
    # ceil(rows/2) so the "parallel" row axis has >= 2 grid steps whenever
    # possible (megacore sharding on v7x; harmless on v5e/v6e).
    half = _round_up(max(1, -(-rows // 2)), 16)
    return max(16, min(_round_up(requested, 16), half))


def _pick_k_tile(k):
    # Stream the contraction dim in 256-multiples (full 2x256 MXU width on
    # v6e/v7x, also fine for v5e's 4x128 MXUs), falling back to 128-multiples,
    # else a single full-K step.  Always divides K exactly: no masked K tail,
    # so partial OOB data can never corrupt valid rows.
    if k % 256 == 0:
        return 256
    if k % 128 == 0:
        return 128
    return k


def _silu(x):
    return x * jax.nn.sigmoid(x)


def _gelu_tanh(x):
    return 0.5 * x * (1.0 + jnp.tanh(_SQRT_2_OVER_PI * (x + 0.044715 * x * x * x)))


def _gelu_erf(x):
    return 0.5 * x * (1.0 + jax.lax.erf(x * _INV_SQRT_2))


def _layer_norm(x, w, b, eps=_LN_EPS):
    # FP32LayerNorm, two-pass statistics (PyTorch-parity numerics).
    mu = jnp.mean(x, axis=-1, keepdims=True)
    xc = x - mu
    var = jnp.mean(xc * xc, axis=-1, keepdims=True)
    return xc * jax.lax.rsqrt(var + eps) * w + b


# ---------------------------------------------------------------------------
# Time path (plain XLA):
#   timesteps -> Timesteps(flip_sin_to_cos=True, shift=0)
#             -> TimestepEmbedding (Linear, SiLU, Linear)  => temb
#   timestep_proj = time_proj(SiLU(temb))
# At batch ~ 2 the rows pad to 8 sublanes; a pallas_call here is pure launch
# and DMA overhead, so this stays as ordinary XLA ops.
# ---------------------------------------------------------------------------
def time_path(timestep, freqs, w1, b1, w2, b2, wp, bp, out_dtype):
    n = timestep.size
    t = timestep.reshape(n, 1).astype(jnp.float32)
    args = t * freqs                                                # (B, half)
    emb = jnp.concatenate([jnp.cos(args), jnp.sin(args)], axis=-1)  # flip_sin_to_cos=True
    h = _silu(jnp.dot(emb, w1, preferred_element_type=jnp.float32) + b1)
    temb = jnp.dot(h, w2, preferred_element_type=jnp.float32) + b2
    temb = temb.astype(out_dtype)
    tproj = (jnp.dot(_silu(temb.astype(jnp.float32)), wp,
                     preferred_element_type=jnp.float32) + bp).astype(out_dtype)
    return temb, tproj


# ---------------------------------------------------------------------------
# Kernel 1: fused two-layer MLP with K-streamed first GEMM.
#   out = act(x @ W1 + b1) @ W2 + b2
# Grid = (row_tiles, k_tiles); k is the reduction over W1's input dim.
# Used for the text embedder (PixArtAlphaTextProjection, act_fn='gelu_tanh').
# ---------------------------------------------------------------------------
def _mlp_kernel(x_ref, w1_ref, b1_ref, w2_ref, b2_ref, o_ref, acc_ref, *, act):
    k = pl.program_id(1)

    @pl.when(k == 0)
    def _():
        acc_ref[...] = jnp.zeros_like(acc_ref)

    x = x_ref[...]
    if x.dtype != jnp.bfloat16:
        x = x.astype(jnp.bfloat16)          # VPU cast; bf16 callers skip this
    acc_ref[...] += jnp.dot(x, w1_ref[...], preferred_element_type=jnp.float32)

    @pl.when(k == pl.num_programs(1) - 1)
    def _():
        h = act(acc_ref[...] + b1_ref[...])                         # f32 VPU/EUP
        o = jnp.dot(h.astype(jnp.bfloat16), w2_ref[...],
                    preferred_element_type=jnp.float32) + b2_ref[...]
        o_ref[...] = o.astype(o_ref.dtype)


def _fused_mlp(x2, w1, b1, w2, b2, *, act, out_dtype, row_tile):
    rows, kdim = x2.shape
    hdim = w1.shape[1]
    ddim = w2.shape[1]
    tile = _pick_row_tile(rows, row_tile)
    tk = _pick_k_tile(kdim)
    grid = (pl.cdiv(rows, tile), kdim // tk)
    const = dict(pipeline_mode=pl.Buffered(1))   # single VMEM copy for grid-invariant operands
    # TODO(synk): at widths where W2 (hdim x ddim) itself exceeds the VMEM
    # budget, split the second GEMM into its own K-tiled pallas_call (or nest
    # pltpu.emit_pipeline) instead of holding W2 as a full Buffered(1) block.
    return pl.pallas_call(
        functools.partial(_mlp_kernel, act=act),
        out_shape=jax.ShapeDtypeStruct((rows, ddim), out_dtype),
        grid=grid,
        in_specs=[
            pl.BlockSpec((tile, tk), lambda i, k: (i, k)),          # activations, streamed
            pl.BlockSpec((tk, hdim), lambda i, k: (k, 0)),          # W1 chunks, double-buffered
            pl.BlockSpec((1, hdim), lambda i, k: (0, 0), **const),  # b1
            pl.BlockSpec((hdim, ddim), lambda i, k: (0, 0), **const),  # W2 (resident)
            pl.BlockSpec((1, ddim), lambda i, k: (0, 0), **const),  # b2
        ],
        out_specs=pl.BlockSpec((tile, ddim), lambda i, k: (i, 0)),
        scratch_shapes=[pltpu.VMEM((tile, hdim), jnp.float32)],     # f32 accumulator
        compiler_params=pltpu.CompilerParams(
            dimension_semantics=("parallel", "arbitrary"),
            vmem_limit_bytes=_VMEM_LIMIT),
    )(x2, w1, b1, w2, b2)


def text_embedder(x, w1, b1, w2, b2, *, row_tile=None):
    b, s, t = x.shape
    rows = b * s
    out = _fused_mlp(x.reshape(rows, t), w1, b1, w2, b2,
                     act=_gelu_tanh, out_dtype=x.dtype,
                     row_tile=row_tile or _DEFAULT_ROW_TILE)
    return out.reshape(b, s, w2.shape[1])


# ---------------------------------------------------------------------------
# Kernel 2: image embedder (WanImageEmbedding)
#   FP32LayerNorm -> FeedForward(mult=1, 'gelu' = exact erf GELU) -> FP32LayerNorm
# FP32LayerNorm needs the full channel row before the first matmul, so the
# grid has a single row axis; all weights are grid-invariant Buffered(1)
# blocks (<~17 MiB bf16 at production Wan widths, fits all generations).
# ---------------------------------------------------------------------------
def _image_kernel(x_ref, n1w_ref, n1b_ref, w1_ref, b1_ref, w2_ref, b2_ref,
                  n2w_ref, n2b_ref, o_ref):
    x = x_ref[...].astype(jnp.float32)                 # raw input needed in f32 for LN
    xn = _layer_norm(x, n1w_ref[...], n1b_ref[...])
    h = jnp.dot(xn.astype(jnp.bfloat16), w1_ref[...],
                preferred_element_type=jnp.float32) + b1_ref[...]
    h = _gelu_erf(h)
    y = jnp.dot(h.astype(jnp.bfloat16), w2_ref[...],
                preferred_element_type=jnp.float32) + b2_ref[...]
    o_ref[...] = _layer_norm(y, n2w_ref[...], n2b_ref[...]).astype(o_ref.dtype)


def image_embedder(x, params, pos_embed=None, *, row_tile=None):
    if pos_embed is not None:
        # TODO(synk): pos_embed path (view(-1, 2*seq, embed) + pos_embed) is
        # host-side glue; only exercised when pos_embed_seq_len is set.
        b, s, c = x.shape
        x = x.reshape(-1, 2 * s, c) + pos_embed
    b, s, c = x.shape
    rows = b * s
    d = params["img_w2"].shape[1]
    tile = _pick_row_tile(rows, row_tile or _DEFAULT_ROW_TILE)
    const = dict(pipeline_mode=pl.Buffered(1))
    out = pl.pallas_call(
        _image_kernel,
        out_shape=jax.ShapeDtypeStruct((rows, d), x.dtype),
        grid=(pl.cdiv(rows, tile),),
        in_specs=[
            pl.BlockSpec((tile, c), lambda i: (i, 0)),
            pl.BlockSpec((1, c), lambda i: (0, 0), **const),
            pl.BlockSpec((1, c), lambda i: (0, 0), **const),
            pl.BlockSpec((c, c), lambda i: (0, 0), **const),
            pl.BlockSpec((1, c), lambda i: (0, 0), **const),
            pl.BlockSpec((c, d), lambda i: (0, 0), **const),
            pl.BlockSpec((1, d), lambda i: (0, 0), **const),
            pl.BlockSpec((1, d), lambda i: (0, 0), **const),
            pl.BlockSpec((1, d), lambda i: (0, 0), **const),
        ],
        out_specs=pl.BlockSpec((tile, d), lambda i: (i, 0)),
        compiler_params=pltpu.CompilerParams(
            dimension_semantics=("parallel",),
            vmem_limit_bytes=_VMEM_LIMIT),
    )(x.reshape(rows, c), params["img_n1w"], params["img_n1b"],
      params["img_w1"], params["img_b1"], params["img_w2"], params["img_b2"],
      params["img_n2w"], params["img_n2b"])
    return out.reshape(b, s, d)


# ---------------------------------------------------------------------------
# Full module forward
# ---------------------------------------------------------------------------
def wan_time_text_image_embedding(timestep, encoder_hidden_states,
                                  encoder_hidden_states_image, params):
    out_dtype = encoder_hidden_states.dtype
    temb, timestep_proj = time_path(
        timestep, params["freqs"],
        params["time_w1"], params["time_b1"],
        params["time_w2"], params["time_b2"],
        params["tproj_w"], params["tproj_b"],
        out_dtype)
    encoder_hidden_states = text_embedder(
        encoder_hidden_states,
        params["text_w1"], params["text_b1"],
        params["text_w2"], params["text_b2"])
    image_out = None
    if encoder_hidden_states_image is not None:
        image_out = image_embedder(encoder_hidden_states_image, params,
                                   pos_embed=params.get("pos_embed"))
    return temb, timestep_proj, encoder_hidden_states, image_out


# ---------------------------------------------------------------------------
# Pure-JAX reference (mirrors the kernels' bf16-operand / f32-accumulate math)
# ---------------------------------------------------------------------------
def _linear_bf16(x, w, b):
    return jnp.dot(x.astype(jnp.bfloat16), w.astype(jnp.bfloat16),
                   preferred_element_type=jnp.float32) + b


def _reference(timestep, text, image, params):
    n = timestep.size
    args = timestep.reshape(n, 1).astype(jnp.float32) * params["freqs"]
    emb = jnp.concatenate([jnp.cos(args), jnp.sin(args)], axis=-1)
    h = _silu(jnp.dot(emb, params["time_w1"],
                      preferred_element_type=jnp.float32) + params["time_b1"])
    temb = jnp.dot(h, params["time_w2"],
                   preferred_element_type=jnp.float32) + params["time_b2"]
    tproj = jnp.dot(_silu(temb), params["tproj_w"],
                    preferred_element_type=jnp.float32) + params["tproj_b"]

    ht = _gelu_tanh(_linear_bf16(text, params["text_w1"], params["text_b1"]))
    text_out = _linear_bf16(ht, params["text_w2"], params["text_b2"])

    xi = _layer_norm(image.astype(jnp.float32), params["img_n1w"], params["img_n1b"])
    hi = _gelu_erf(_linear_bf16(xi, params["img_w1"], params["img_b1"]))
    yi = _linear_bf16(hi, params["img_w2"], params["img_b2"])
    img_out = _layer_norm(yi, params["img_n2w"], params["img_n2b"])
    return temb, tproj, text_out, img_out


def _init_linear(key, fan_in, fan_out, w_dtype=jnp.float32):
    kw, kb = jax.random.split(key)
    w = (jax.random.normal(kw, (fan_in, fan_out), jnp.float32) * 0.02).astype(w_dtype)
    b = jax.random.normal(kb, (1, fan_out), jnp.float32) * 0.02
    return w, b


if __name__ == "__main__":
    # Small, TPU-friendly configuration (Wan-like ratios, demo-sized dims).
    B = 2
    dim = 128
    time_freq_dim = 256          # sinusoidal embedding size (even)
    time_proj_dim = 6 * dim      # 768, as in Wan
    text_embed_dim = 512         # -> tk=256, 2 K-steps (exercises the accumulator path)
    text_seq = 150               # rows=300 -> row tile 160, 2 parallel steps + partial tail
    image_embed_dim = 256
    image_seq = 77               # rows=154 -> row tile 80, 2 parallel steps + partial tail

    key = jax.random.PRNGKey(0)
    keys = jax.random.split(key, 16)

    half = time_freq_dim // 2
    freqs = jnp.exp(-math.log(10000.0) * jnp.arange(half, dtype=jnp.float32) / half)
    freqs = freqs.reshape(1, half)

    params = {"freqs": freqs}
    # Time path stays f32 (tiny GEMMs, plain XLA).
    params["time_w1"], params["time_b1"] = _init_linear(keys[0], time_freq_dim, dim)
    params["time_w2"], params["time_b2"] = _init_linear(keys[1], dim, dim)
    params["tproj_w"], params["tproj_b"] = _init_linear(keys[2], dim, time_proj_dim)
    # Matmul weights for the Pallas paths are stored in bf16 ONCE (no per-call
    # astype inside the jitted forward); biases / LayerNorm params stay f32.
    params["text_w1"], params["text_b1"] = _init_linear(keys[3], text_embed_dim, dim,
                                                        w_dtype=jnp.bfloat16)
    params["text_w2"], params["text_b2"] = _init_linear(keys[4], dim, dim,
                                                        w_dtype=jnp.bfloat16)
    # WanImageEmbedding: norm1 (in), ff Linear(in,in)->GELU->Linear(in,dim), norm2 (dim)
    params["img_n1w"] = 1.0 + 0.02 * jax.random.normal(keys[5], (1, image_embed_dim), jnp.float32)
    params["img_n1b"] = 0.02 * jax.random.normal(keys[6], (1, image_embed_dim), jnp.float32)
    params["img_w1"], params["img_b1"] = _init_linear(keys[7], image_embed_dim, image_embed_dim,
                                                      w_dtype=jnp.bfloat16)
    params["img_w2"], params["img_b2"] = _init_linear(keys[8], image_embed_dim, dim,
                                                      w_dtype=jnp.bfloat16)
    params["img_n2w"] = 1.0 + 0.02 * jax.random.normal(keys[9], (1, dim), jnp.float32)
    params["img_n2b"] = 0.02 * jax.random.normal(keys[10], (1, dim), jnp.float32)
    params["pos_embed"] = None

    timestep = jax.random.uniform(keys[11], (B,), jnp.float32, 0.0, 1000.0)
    encoder_hidden_states = jax.random.normal(keys[12], (B, text_seq, text_embed_dim), jnp.float32)
    encoder_hidden_states_image = jax.random.normal(keys[13], (B, image_seq, image_embed_dim), jnp.float32)

    fwd = jax.jit(wan_time_text_image_embedding)
    temb, tproj, text_out, img_out = fwd(
        timestep, encoder_hidden_states, encoder_hidden_states_image, params)
    jax.block_until_ready((temb, tproj, text_out, img_out))

    # Correctness check against a pure-JAX reference using the same math.
    r_temb, r_tproj, r_text, r_img = _reference(
        timestep, encoder_hidden_states, encoder_hidden_states_image, params)
    assert temb.shape == (B, dim) and tproj.shape == (B, time_proj_dim)
    assert text_out.shape == (B, text_seq, dim)
    assert img_out.shape == (B, image_seq, dim)
    for got, ref in ((temb, r_temb), (tproj, r_tproj), (text_out, r_text), (img_out, r_img)):
        err = float(jnp.max(jnp.abs(got.astype(jnp.float32) - ref.astype(jnp.float32))))
        assert err < 1e-2, err

    print("KERNEL_OK")
</pallas_src>

<mosaic_0001>
module attributes {stable_mosaic.version = 11 : i64} {
  func.func @_mlp_kernel(%arg0: i32, %arg1: i32, %arg2: memref<160x256xf32, #tpu.memory_space<vmem>>, %arg3: memref<256x128xbf16, #tpu.memory_space<vmem>>, %arg4: memref<1x128xf32, #tpu.memory_space<vmem>>, %arg5: memref<128x128xbf16, #tpu.memory_space<vmem>>, %arg6: memref<1x128xf32, #tpu.memory_space<vmem>>, %arg7: memref<160x128xf32, #tpu.memory_space<vmem>>, %arg8: memref<160x128xf32, #tpu.memory_space<vmem>>) attributes {dimension_semantics = [#tpu.dimension_semantics<parallel>, #tpu.dimension_semantics<arbitrary>], iteration_bounds = array<i64: 2, 2>, scalar_prefetch = 0 : i64, scratch_operands = 1 : i64, tpu.core_type = #tpu.core_type<tc>, window_params = [{transform_indices = @transform_0, window_bounds = array<i64: 160, 256>}, {transform_indices = @transform_1, window_bounds = array<i64: 256, 128>}, {pipeline_mode = #tpu.pipeline_mode<synchronous>, transform_indices = @transform_2, window_bounds = array<i64: 1, 128>}, {pipeline_mode = #tpu.pipeline_mode<synchronous>, transform_indices = @transform_3, window_bounds = array<i64: 128, 128>}, {pipeline_mode = #tpu.pipeline_mode<synchronous>, transform_indices = @transform_4, window_bounds = array<i64: 1, 128>}, {transform_indices = @transform_5, window_bounds = array<i64: 160, 128>}]} {
    %c0_i32 = arith.constant 0 : i32
    %0 = arith.cmpi eq, %arg1, %c0_i32 : i32
    %1 = arith.extui %0 : i1 to i32
    %c0_i32_0 = arith.constant 0 : i32
    %2 = arith.cmpi ne, %1, %c0_i32_0 : i32
    scf.if %2 {
      %cst_9 = arith.constant 0.000000e+00 : f32
      %13 = vector.broadcast %cst_9 : f32 to vector<160x128xf32>
      %c0_10 = arith.constant 0 : index
      %c0_11 = arith.constant 0 : index
      %14 = vector.load %arg8[%c0_10, %c0_11] : memref<160x128xf32, #tpu.memory_space<vmem>>, vector<160x128xf32>
      tpu.vector_store %arg8[%c0_10, %c0_11], %13 {strides = array<i32>} : memref<160x128xf32, #tpu.memory_space<vmem>>, vector<160x128xf32>,
    } else {
    }
    %c0 = arith.constant 0 : index
    %c0_1 = arith.constant 0 : index
    %3 = vector.load %arg2[%c0, %c0_1] : memref<160x256xf32, #tpu.memory_space<vmem>>, vector<160x256xf32>
    %4 = arith.truncf %3 : vector<160x256xf32> to vector<160x256xbf16>
    %c0_2 = arith.constant 0 : index
    %c0_3 = arith.constant 0 : index
    %5 = vector.load %arg8[%c0_2, %c0_3] : memref<160x128xf32, #tpu.memory_space<vmem>>, vector<160x128xf32>
    %c0_4 = arith.constant 0 : index
    %c0_5 = arith.constant 0 : index
    %6 = vector.load %arg3[%c0_4, %c0_5] : memref<256x128xbf16, #tpu.memory_space<vmem>>, vector<256x128xbf16>
    %cst = arith.constant dense<0.000000e+00> : vector<160x128xf32>
    %7 = tpu.matmul %4, %6, %cst {dimension_numbers = #tpu.dot_dimension_numbers<[1], [0], [0], [1], [0, 0, 1, 1], [], []>} : vector<160x256xbf16>, vector<256x128xbf16>, vector<160x128xf32> -> vector<160x128xf32>
    %8 = arith.addf %5, %7 : vector<160x128xf32>
    %c0_6 = arith.constant 0 : index
    %c0_7 = arith.constant 0 : index
    %9 = vector.load %arg8[%c0_6, %c0_7] : memref<160x128xf32, #tpu.memory_space<vmem>>, vector<160x128xf32>
    tpu.vector_store %arg8[%c0_6, %c0_7], %8 {strides = array<i32>} : memref<160x128xf32, #tpu.memory_space<vmem>>, vector<160x128xf32>,
    %c1_i32 = arith.constant 1 : i32
    %10 = arith.cmpi eq, %arg1, %c1_i32 : i32
    %11 = arith.extui %10 : i1 to i32
    %c0_i32_8 = arith.constant 0 : i32
    %12 = arith.cmpi ne, %11, %c0_i32_8 : i32
    scf.if %12 {
      %c0_9 = arith.constant 0 : index
      %c0_10 = arith.constant 0 : index
      %13 = vector.load %arg8[%c0_9, %c0_10] : memref<160x128xf32, #tpu.memory_space<vmem>>, vector<160x128xf32>
      %c0_11 = arith.constant 0 : index
      %c0_12 = arith.constant 0 : index
      %14 = vector.load %arg4[%c0_11, %c0_12] : memref<1x128xf32, #tpu.memory_space<vmem>>, vector<1x128xf32>
      %15 = vector.broadcast %14 : vector<1x128xf32> to vector<160x128xf32>
      %16 = arith.addf %13, %15 : vector<160x128xf32>
      %cst_13 = arith.constant 5.000000e-01 : f32
      %17 = vector.broadcast %cst_13 : f32 to vector<160x128xf32>
      %18 = arith.mulf %17, %16 : vector<160x128xf32>
      %cst_14 = arith.constant 4.471500e-02 : f32
      %19 = vector.broadcast %cst_14 : f32 to vector<160x128xf32>
      %20 = arith.mulf %19, %16 : vector<160x128xf32>
      %21 = arith.mulf %20, %16 : vector<160x128xf32>
      %22 = arith.mulf %21, %16 : vector<160x128xf32>
      %23 = arith.addf %16, %22 : vector<160x128xf32>
      %cst_15 = arith.constant 0.797884583 : f32
      %24 = vector.broadcast %cst_15 : f32 to vector<160x128xf32>
      %25 = arith.mulf %24, %23 : vector<160x128xf32>
      %26 = math.tanh %25 : vector<160x128xf32>
      %cst_16 = arith.constant 1.000000e+00 : f32
      %27 = vector.broadcast %cst_16 : f32 to vector<160x128xf32>
      %28 = arith.addf %27, %26 : vector<160x128xf32>
      %29 = arith.mulf %18, %28 : vector<160x128xf32>
      %30 = arith.truncf %29 : vector<160x128xf32> to vector<160x128xbf16>
      %c0_17 = arith.constant 0 : index
      %c0_18 = arith.constant 0 : index
      %31 = vector.load %arg5[%c0_17, %c0_18] : memref<128x128xbf16, #tpu.memory_space<vmem>>, vector<128x128xbf16>
      %cst_19 = arith.constant dense<0.000000e+00> : vector<160x128xf32>
      %32 = tpu.matmul %30, %31, %cst_19 {dimension_numbers = #tpu.dot_dimension_numbers<[1], [0], [0], [1], [0, 0, 1, 1], [], []>} : vector<160x128xbf16>, vector<128x128xbf16>, vector<160x128xf32> -> vector<160x128xf32>
      %c0_20 = arith.constant 0 : index
      %c0_21 = arith.constant 0 : index
      %33 = vector.load %arg6[%c0_20, %c0_21] : memref<1x128xf32, #tpu.memory_space<vmem>>, vector<1x128xf32>
      %34 = vector.broadcast %33 : vector<1x128xf32> to vector<160x128xf32>
      %35 = arith.addf %32, %34 : vector<160x128xf32>
      %c0_22 = arith.constant 0 : index
      %c0_23 = arith.constant 0 : index
      %36 = vector.load %arg7[%c0_22, %c0_23] : memref<160x128xf32, #tpu.memory_space<vmem>>, vector<160x128xf32>
      tpu.vector_store %arg7[%c0_22, %c0_23], %35 {strides = array<i32>} : memref<160x128xf32, #tpu.memory_space<vmem>>, vector<160x128xf32>,
    } else {
    }
    return
  }
  func.func @transform_0(%arg0: i32, %arg1: i32) -> (i32, i32) {
    %c0_i32 = arith.constant 0 : i32
    return %arg0, %arg1 : i32, i32
  }
  func.func @transform_1(%arg0: i32, %arg1: i32) -> (i32, i32) {
    %c0_i32 = arith.constant 0 : i32
    %c0_i32_0 = arith.constant 0 : i32
    return %arg1, %c0_i32 : i32, i32
  }
  func.func @transform_2(%arg0: i32, %arg1: i32) -> (i32, i32) {
    %c0_i32 = arith.constant 0 : i32
    %c0_i32_0 = arith.constant 0 : i32
    %c0_i32_1 = arith.constant 0 : i32
    return %c0_i32, %c0_i32_0 : i32, i32
  }
  func.func @transform_3(%arg0: i32, %arg1: i32) -> (i32, i32) {
    %c0_i32 = arith.constant 0 : i32
    %c0_i32_0 = arith.constant 0 : i32
    %c0_i32_1 = arith.constant 0 : i32
    return %c0_i32, %c0_i32_0 : i32, i32
  }
  func.func @transform_4(%arg0: i32, %arg1: i32) -> (i32, i32) {
    %c0_i32 = arith.constant 0 : i32
    %c0_i32_0 = arith.constant 0 : i32
    %c0_i32_1 = arith.constant 0 : i32
    return %c0_i32, %c0_i32_0 : i32, i32
  }
  func.func @transform_5(%arg0: i32, %arg1: i32) -> (i32, i32) {
    %c0_i32 = arith.constant 0 : i32
    %c0_i32_0 = arith.constant 0 : i32
    return %arg0, %c0_i32 : i32, i32
  }
}

module attributes {stable_mosaic.version = 11 : i64} {
  func.func @_image_kernel(%arg0: i32, %arg1: memref<80x256xf32, #tpu.memory_space<vmem>>, %arg2: memref<1x256xf32, #tpu.memory_space<vmem>>, %arg3: memref<1x256xf32, #tpu.memory_space<vmem>>, %arg4: memref<256x256xbf16, #tpu.memory_space<vmem>>, %arg5: memref<1x256xf32, #tpu.memory_space<vmem>>, %arg6: memref<256x128xbf16, #tpu.memory_space<vmem>>, %arg7: memref<1x128xf32, #tpu.memory_space<vmem>>, %arg8: memref<1x128xf32, #tpu.memory_space<vmem>>, %arg9: memref<1x128xf32, #tpu.memory_space<vmem>>, %arg10: memref<80x128xf32, #tpu.memory_space<vmem>>) attributes {dimension_semantics = [#tpu.dimension_semantics<parallel>], iteration_bounds = array<i64: 2>, scalar_prefetch = 0 : i64, scratch_operands = 0 : i64, tpu.core_type = #tpu.core_type<tc>, window_params = [{transform_indices = @transform_0, window_bounds = array<i64: 80, 256>}, {pipeline_mode = #tpu.pipeline_mode<synchronous>, transform_indices = @transform_1, window_bounds = array<i64: 1, 256>}, {pipeline_mode = #tpu.pipeline_mode<synchronous>, transform_indices = @transform_2, window_bounds = array<i64: 1, 256>}, {pipeline_mode = #tpu.pipeline_mode<synchronous>, transform_indices = @transform_3, window_bounds = array<i64: 256, 256>}, {pipeline_mode = #tpu.pipeline_mode<synchronous>, transform_indices = @transform_4, window_bounds = array<i64: 1, 256>}, {pipeline_mode = #tpu.pipeline_mode<synchronous>, transform_indices = @transform_5, window_bounds = array<i64: 256, 128>}, {pipeline_mode = #tpu.pipeline_mode<synchronous>, transform_indices = @transform_6, window_bounds = array<i64: 1, 128>}, {pipeline_mode = #tpu.pipeline_mode<synchronous>, transform_indices = @transform_7, window_bounds = array<i64: 1, 128>}, {pipeline_mode = #tpu.pipeline_mode<synchronous>, transform_indices = @transform_8, window_bounds = array<i64: 1, 128>}, {transform_indices = @transform_9, window_bounds = array<i64: 80, 128>}]} {
    %c0 = arith.constant 0 : index
    %c0_0 = arith.constant 0 : index
    %0 = vector.load %arg1[%c0, %c0_0] : memref<80x256xf32, #tpu.memory_space<vmem>>, vector<80x256xf32>
    %c0_1 = arith.constant 0 : index
    %c0_2 = arith.constant 0 : index
    %1 = vector.load %arg2[%c0_1, %c0_2] : memref<1x256xf32, #tpu.memory_space<vmem>>, vector<1x256xf32>
    %c0_3 = arith.constant 0 : index
    %c0_4 = arith.constant 0 : index
    %2 = vector.load %arg3[%c0_3, %c0_4] : memref<1x256xf32, #tpu.memory_space<vmem>>, vector<1x256xf32>
    %cst = arith.constant dense<0.000000e+00> : vector<80xf32>
    %3 = vector.multi_reduction <add>, %0, %cst [1] : vector<80x256xf32> to vector<80xf32>
    %4 = vector.shape_cast %3 : vector<80xf32> to vector<80x1xf32>
    %cst_5 = arith.constant 2.560000e+02 : f32
    %5 = vector.broadcast %cst_5 : f32 to vector<80x1xf32>
    %6 = arith.divf %4, %5 : vector<80x1xf32>
    %7 = vector.broadcast %6 : vector<80x1xf32> to vector<80x256xf32>
    %8 = arith.subf %0, %7 : vector<80x256xf32>
    %9 = arith.mulf %8, %8 : vector<80x256xf32>
    %cst_6 = arith.constant dense<0.000000e+00> : vector<80xf32>
    %10 = vector.multi_reduction <add>, %9, %cst_6 [1] : vector<80x256xf32> to vector<80xf32>
    %11 = vector.shape_cast %10 : vector<80xf32> to vector<80x1xf32>
    %cst_7 = arith.constant 2.560000e+02 : f32
    %12 = vector.broadcast %cst_7 : f32 to vector<80x1xf32>
    %13 = arith.divf %11, %12 : vector<80x1xf32>
    %cst_8 = arith.constant 9.99999974E-6 : f32
    %14 = vector.broadcast %cst_8 : f32 to vector<80x1xf32>
    %15 = arith.addf %13, %14 : vector<80x1xf32>
    %16 = math.rsqrt %15 : vector<80x1xf32>
    %17 = vector.broadcast %16 : vector<80x1xf32> to vector<80x256xf32>
    %18 = arith.mulf %8, %17 : vector<80x256xf32>
    %19 = vector.broadcast %1 : vector<1x256xf32> to vector<80x256xf32>
    %20 = arith.mulf %18, %19 : vector<80x256xf32>
    %21 = vector.broadcast %2 : vector<1x256xf32> to vector<80x256xf32>
    %22 = arith.addf %20, %21 : vector<80x256xf32>
    %23 = arith.truncf %22 : vector<80x256xf32> to vector<80x256xbf16>
    %c0_9 = arith.constant 0 : index
    %c0_10 = arith.constant 0 : index
    %24 = vector.load %arg4[%c0_9, %c0_10] : memref<256x256xbf16, #tpu.memory_space<vmem>>, vector<256x256xbf16>
    %cst_11 = arith.constant dense<0.000000e+00> : vector<80x256xf32>
    %25 = tpu.matmul %23, %24, %cst_11 {dimension_numbers = #tpu.dot_dimension_numbers<[1], [0], [0], [1], [0, 0, 1, 1], [], []>} : vector<80x256xbf16>, vector<256x256xbf16>, vector<80x256xf32> -> vector<80x256xf32>
    %c0_12 = arith.constant 0 : index
    %c0_13 = arith.constant 0 : index
    %26 = vector.load %arg5[%c0_12, %c0_13] : memref<1x256xf32, #tpu.memory_space<vmem>>, vector<1x256xf32>
    %27 = vector.broadcast %26 : vector<1x256xf32> to vector<80x256xf32>
    %28 = arith.addf %25, %27 : vector<80x256xf32>
    %cst_14 = arith.constant 5.000000e-01 : f32
    %29 = vector.broadcast %cst_14 : f32 to vector<80x256xf32>
    %30 = arith.mulf %29, %28 : vector<80x256xf32>
    %cst_15 = arith.constant 0.707106769 : f32
    %31 = vector.broadcast %cst_15 : f32 to vector<80x256xf32>
    %32 = arith.mulf %28, %31 : vector<80x256xf32>
    %33 = math.erf %32 : vector<80x256xf32>
    %cst_16 = arith.constant 1.000000e+00 : f32
    %34 = vector.broadcast %cst_16 : f32 to vector<80x256xf32>
    %35 = arith.addf %34, %33 : vector<80x256xf32>
    %36 = arith.mulf %30, %35 : vector<80x256xf32>
    %37 = arith.truncf %36 : vector<80x256xf32> to vector<80x256xbf16>
    %c0_17 = arith.constant 0 : index
    %c0_18 = arith.constant 0 : index
    %38 = vector.load %arg6[%c0_17, %c0_18] : memref<256x128xbf16, #tpu.memory_space<vmem>>, vector<256x128xbf16>
    %cst_19 = arith.constant dense<0.000000e+00> : vector<80x128xf32>
    %39 = tpu.matmul %37, %38, %cst_19 {dimension_numbers = #tpu.dot_dimension_numbers<[1], [0], [0], [1], [0, 0, 1, 1], [], []>} : vector<80x256xbf16>, vector<256x128xbf16>, vector<80x128xf32> -> vector<80x128xf32>
    %c0_20 = arith.constant 0 : index
    %c0_21 = arith.constant 0 : index
    %40 = vector.load %arg7[%c0_20, %c0_21] : memref<1x128xf32, #tpu.memory_space<vmem>>, vector<1x128xf32>
    %41 = vector.broadcast %40 : vector<1x128xf32> to vector<80x128xf32>
    %42 = arith.addf %39, %41 : vector<80x128xf32>
    %c0_22 = arith.constant 0 : index
    %c0_23 = arith.constant 0 : index
    %43 = vector.load %arg8[%c0_22, %c0_23] : memref<1x128xf32, #tpu.memory_space<vmem>>, vector<1x128xf32>
    %c0_24 = arith.constant 0 : index
    %c0_25 = arith.constant 0 : index
    %44 = vector.load %arg9[%c0_24, %c0_25] : memref<1x128xf32, #tpu.memory_space<vmem>>, vector<1x128xf32>
    %cst_26 = arith.constant dense<0.000000e+00> : vector<80xf32>
    %45 = vector.multi_reduction <add>, %42, %cst_26 [1] : vector<80x128xf32> to vector<80xf32>
    %46 = vector.shape_cast %45 : vector<80xf32> to vector<80x1xf32>
    %cst_27 = arith.constant 1.280000e+02 : f32
    %47 = vector.broadcast %cst_27 : f32 to vector<80x1xf32>
    %48 = arith.divf %46, %47 : vector<80x1xf32>
    %49 = vector.broadcast %48 : vector<80x1xf32> to vector<80x128xf32>
    %50 = arith.subf %42, %49 : vector<80x128xf32>
    %51 = arith.mulf %50, %50 : vector<80x128xf32>
    %cst_28 = arith.constant dense<0.000000e+00> : vector<80xf32>
    %52 = vector.multi_reduction <add>, %51, %cst_28 [1] : vector<80x128xf32> to vector<80xf32>
    %53 = vector.shape_cast %52 : vector<80xf32> to vector<80x1xf32>
    %cst_29 = arith.constant 1.280000e+02 : f32
    %54 = vector.broadcast %cst_29 : f32 to vector<80x1xf32>
    %55 = arith.divf %53, %54 : vector<80x1xf32>
    %cst_30 = arith.constant 9.99999974E-6 : f32
    %56 = vector.broadcast %cst_30 : f32 to vector<80x1xf32>
    %57 = arith.addf %55, %56 : vector<80x1xf32>
    %58 = math.rsqrt %57 : vector<80x1xf32>
    %59 = vector.broadcast %58 : vector<80x1xf32> to vector<80x128xf32>
    %60 = arith.mulf %50, %59 : vector<80x128xf32>
    %61 = vector.broadcast %43 : vector<1x128xf32> to vector<80x128xf32>
    %62 = arith.mulf %60, %61 : vector<80x128xf32>
    %63 = vector.broadcast %44 : vector<1x128xf32> to vector<80x128xf32>
    %64 = arith.addf %62, %63 : vector<80x128xf32>
    %c0_31 = arith.constant 0 : index
    %c0_32 = arith.constant 0 : index
    %65 = vector.load %arg10[%c0_31, %c0_32] : memref<80x128xf32, #tpu.memory_space<vmem>>, vector<80x128xf32>
    tpu.vector_store %arg10[%c0_31, %c0_32], %64 {strides = array<i32>} : memref<80x128xf32, #tpu.memory_space<vmem>>, vector<80x128xf32>,
    return
  }
  func.func @transform_0(%arg0: i32) -> (i32, i32) {
    %c0_i32 = arith.constant 0 : i32
    %c0_i32_0 = arith.constant 0 : i32
    return %arg0, %c0_i32 : i32, i32
  }
  func.func @transform_1(%arg0: i32) -> (i32, i32) {
    %c0_i32 = arith.constant 0 : i32
    %c0_i32_0 = arith.constant 0 : i32
    %c0_i32_1 = arith.constant 0 : i32
    return %c0_i32, %c0_i32_0 : i32, i32
  }
  func.func @transform_2(%arg0: i32) -> (i32, i32) {
    %c0_i32 = arith.constant 0 : i32
    %c0_i32_0 = arith.constant 0 : i32
    %c0_i32_1 = arith.constant 0 : i32
    return %c0_i32, %c0_i32_0 : i32, i32
  }
  func.func @transform_3(%arg0: i32) -> (i32, i32) {
    %c0_i32 = arith.constant 0 : i32
    %c0_i32_0 = arith.constant 0 : i32
    %c0_i32_1 = arith.constant 0 : i32
    return %c0_i32, %c0_i32_0 : i32, i32
  }
  func.func @transform_4(%arg0: i32) -> (i32, i32) {
    %c0_i32 = arith.constant 0 : i32
    %c0_i32_0 = arith.constant 0 : i32
    %c0_i32_1 = arith.constant 0 : i32
    return %c0_i32, %c0_i32_0 : i32, i32
  }
  func.func @transform_5(%arg0: i32) -> (i32, i32) {
    %c0_i32 = arith.constant 0 : i32
    %c0_i32_0 = arith.constant 0 : i32
    %c0_i32_1 = arith.constant 0 : i32
    return %c0_i32, %c0_i32_0 : i32, i32
  }
  func.func @transform_6(%arg0: i32) -> (i32, i32) {
    %c0_i32 = arith.constant 0 : i32
    %c0_i32_0 = arith.constant 0 : i32
    %c0_i32_1 = arith.constant 0 : i32
    return %c0_i32, %c0_i32_0 : i32, i32
  }
  func.func @transform_7(%arg0: i32) -> (i32, i32) {
    %c0_i32 = arith.constant 0 : i32
    %c0_i32_0 = arith.constant 0 : i32
    %c0_i32_1 = arith.constant 0 : i32
    return %c0_i32, %c0_i32_0 : i32, i32
  }
  func.func @transform_8(%arg0: i32) -> (i32, i32) {
    %c0_i32 = arith.constant 0 : i32
    %c0_i32_0 = arith.constant 0 : i32
    %c0_i32_1 = arith.constant 0 : i32
    return %c0_i32, %c0_i32_0 : i32, i32
  }
  func.func @transform_9(%arg0: i32) -> (i32, i32) {
    %c0_i32 = arith.constant 0 : i32
    %c0_i32_0 = arith.constant 0 : i32
    return %arg0, %c0_i32 : i32, i32
  }
}

</mosaic_0001>

<bundles_post_ra>
// kernel: wan_time_text_image_embedding.2
= control target key start
LH: loop header
LB: loop body
LE: loop exit
PB: predicated region body
PF: predicated region fallthrough
CT: control target
= control target key end

     0   :  { %s2990_s0 = inlined_call_operand.vmem [shape: f32[300,512], index: 0, kind: input, shape index: {}]   ;;  %s2991_s1 = inlined_call_operand.vmem [shape: bf16[512,128], index: 1, kind: input, shape index: {}]   ;;  %s2992_s2 = inlined_call_operand.vmem [shape: f32[1,128], index: 2, kind: input, shape index: {}]   ;;  %s2993_s3 = inlined_call_operand.vmem [shape: bf16[128,128], index: 3, kind: input, shape index: {}]   ;;  %s2994_s4 = inlined_call_operand.vmem [shape: f32[1,128], index: 4, kind: input, shape index: {}]   ;;  %s2995_s5 = inlined_call_operand.vmem [shape: f32[300,128], index: 5, kind: output, shape index: {}]  }
   0x1   :  { %2999 = sst [smem:[#allocation8_spill]] %s2990_s0 }
   0x2   :  { %s2339_s18 = smov 0   ;;  %s2341_s19 = smov 0  }
   0x3   :  { %s2343_s20 = smov 0   ;;  %s2345_s21 = smov 0  }
   0x4   :  { %s2347_s22 = smov 0   ;;  %s2349_s23 = smov 0  }
   0x5   :  { %s2351_s24 = smov 0   ;;  %s2353_s25 = smov 0  }
   0x6   :  { %s2355_s26 = smov 0  }
   0x7 LB: > { %3000 = sst [smem:[#allocation5_spill]] %s2238_s25  ;;  %s24_s27 = sadd.s32 1, %s2234_s24  ;;  %s2242_s26 = sphi %s2355_s26, %s15_s26   ;;  %s2238_s25 = sphi %s2353_s25, %s3016_s25   ;;  %s2234_s24 = sphi %s2351_s24, %s3022_s24   ;;  %s2230_s23 = sphi %s2349_s23, %s3014_s23   ;;  %s2226_s22 = sphi %s2347_s22, %s3021_s22   ;;  %s2222_s21 = sphi %s2345_s21, %s3020_s21   ;;  %s2218_s20 = sphi %s2343_s20, %s3019_s20   ;;  %s2214_s19 = sphi %s2341_s19, %s3018_s19   ;;  %s2210_s18 = sphi %s2339_s18, %s3017_s18  }
   0x8   : > { %p25_p0 = scmp.ge.s32.totalorder %s24_s27, 2  ;;  %s27_s28 = sadd.s32 1, %s2238_s25 }
   0x9   : > { %p43_p1 = scmp.ne.s32.totalorder %s2222_s21, %s2218_s20  ;;  %s1605_s29 = sadd.s32 4294967295, %s2242_s26  }
   0xa   : > { %s3024_s27 = smov (%p25_p0, %s24_s27), 0  ;;  %s3026_s28 = smov (!%p25_p0, %s27_s28), %s2238_s25 }
   0xb   : > { %3001 = sst [smem:[#allocation6_spill]] %s3024_s27  ;;  %p44_p2 = scmp.eq.s32.totalorder %s2242_s26, 0 }
   0xc   : > { %p29_p3 = scmp.ge.s32.totalorder %s3026_s28, 2  ;;  %s32_s30 = ssub.s32 %s2234_s24, %s3024_s27 }
   0xd   : > { %p2395_p4 = por %p44_p2, %p43_p1  ;;  %p161_p5 = scmp.ne.s32.totalorder %s2214_s19, %s2210_s18 }
   0xe   : > { %s3028_s28 = smov (%p29_p3, %s3026_s28), 0  ;;  %s36_s7 = sadd.s32 1, %s2222_s21 }
   0xf   : > { %3003 = sst [smem:[#allocation7_spill]] %s3028_s28  ;;  %p162_p6 = scmp.eq.s32.totalorder %s1605_s29, 3 }
  0x10   : > { %s31_s8 = ssub.s32 %s2238_s25, %s3028_s28  ;;  %s151_s9 = sadd.s32 1, %s2214_s19 }
  0x11   : > { %s33_s10 = sor.u32 %s32_s30, %s31_s8  ;;  %p149_p7 = scmp.eq.s32.totalorder %s31_s8, 0 }
  0x12   : > { %p34_p8 = scmp.eq.s32.totalorder %s33_s10, 0  ;;  %p2407_p9 = por %p162_p6, %p161_p5 }
  0x13   : > { %s2412_s12 = scalar_select %p149_p7, %s2214_s19, %s151_s9  }
  0x14   : > { %s2415_s13 = scalar_select %p34_p8, %s2222_s21, %s36_s7  }
  0x15   : > { %p1608_p10 = scmp.ge.s32.totalorder %s2242_s26, 4 }
  0x17   : > { %193 = sbr.rel (%p1608_p10) target bundleno = 100 (0x64), region = 28 }
  0x1c   : > { %196 = sbr.rel (!%p2395_p4) target bundleno = 100 (0x64), region = 32  ;;  %s198_s14 = sand.u32 (%p2395_p4), 1, %s2222_s21  }
  0x1d   : > { %s201_s15 = smul.u32 (%p2395_p4), 20, %s2238_s25  ;;  %s1609_s17 = sshll.u32 (%p2395_p4), %s2234_s24, 1 }
  0x1e   : > { %s1830_s16 = smul.u32 (%p2395_p4), 320, %s198_s14  ;;  %s3005_s0 = sld [smem:[#allocation8_spill]] (%p2395_p4) }
  0x1f   : > { %s203_s29 = ssub.s32 (%p2395_p4), 38, %s201_s15  ;;  %s1666_s30 = smul.u32 (%p2395_p4), 80, %s2238_s25 }
  0x20   : > { %p204_p11 = scmp.lt.s32.totalorder (%p2395_p4), %s203_s29, 20  ;;  %s2432_s27 = scalar_lea.vmem (%p2395_p4), [#allocation3], %s1830_s16  }
  0x21   : > { %s210_s8 = sadd.s32 %s1666_s30, %s1609_s17 }
  0x22   : > { %s3030_s29 = smov (!%p204_p11, %s203_s29), 20  ;;  %s1614_s7 = sshll.u32 %s210_s8, 3 }
  0x23   : > { %s1665_s9 = sshll.u32 %s3030_s29, 8 }
  0x24   : > { %s2430_s28 = scalar_lea.vmem %s3005_s0, %s1614_s7   ;;  %p1615_p12 = scmp.eq.s32.totalorder %s1665_s9, 0 }
  0x25   : > { %2036 = sdivrem.u32 (!%p1615_p12), %s3030_s29, 20 }
  0x26   : > { %215 = sbr.rel (%p1615_p12) target bundleno = 100 (0x64), region = 36 }
  0x2e   : > { %s2435_s14 = spop.drf %2036 }
  0x2f   : > { %p1616_p13 = scmp.le.s32.totalorder %s2435_s14, 0 }
  0x30   : > { %s3006_s15 = smov (!%p1616_p13), %s2432_s27  ;;  %s3007_s17 = smov (!%p1616_p13), %s2430_s28 }
  0x31   : > { %1516 = sbr.rel (%p1616_p13) target bundleno = 75 (0x4b), region = 172  ;;  %s2444_s30 = smov (!%p1616_p13), 0  }
  0x32   : > { %s2446_s8 = smov (!%p1616_p13), 0  }
  0x36 LB: >> { %v229_v0 = vld [vmem:[%s2250_s17] sm:$0xff]  ;;  %s309_s16 = sadd.s32 1, %s2254_s30  ;;  %v269_v20 = vld [vmem:[%s2250_s17 + $0x8] sm:$0xff]  ;;  %s223_s8 = sadd.s32 1, %s2258_s8   ;;  %s2258_s8 = sphi %s2446_s8, %s223_s8   ;;  %s2254_s30 = sphi %s2444_s30, %s3010_s30   ;;  %s2250_s17 = sphi %s3007_s17, %s3009_s17   ;;  %s2246_s15 = sphi %s3006_s15, %s3008_s15  }
  0x37   : >> { %v231_v1 = vld [vmem:[%s2250_s17 + $0x20] sm:$0xff]  ;;  %230 = vst [vmem:[%s2246_s15] sm:$0xff] %v229_v0  ;;  %p310_p0 = scmp.ge.s32.totalorder %s309_s16, %s2435_s14  ;;  %270 = vst [vmem:[%s2246_s15 + $0x8] sm:$0xff] %v269_v20  ;;  %v271_v21 = vld [vmem:[%s2250_s17 + $0x28] sm:$0xff]  ;;  %p222_p1 = scmp.ge.s32.totalorder %s223_s8, %s2435_s14 }
  0x38   : >> { %v233_v2 = vld [vmem:[%s2250_s17 + $0x40] sm:$0xff]  ;;  %232 = vst [vmem:[%s2246_s15 + $0x10] sm:$0xff] %v231_v1  ;;  %v273_v22 = vld [vmem:[%s2250_s17 + $0x48] sm:$0xff]  ;;  %272 = vst [vmem:[%s2246_s15 + $0x18] sm:$0xff] %v271_v21 }
  0x39   : >> { %234 = vst [vmem:[%s2246_s15 + $0x20] sm:$0xff] %v233_v2  ;;  %v235_v3 = vld [vmem:[%s2250_s17 + $0x60] sm:$0xff]  ;;  %s3032_s16 = smov (%p310_p0, %s309_s16), 0  ;;  %v275_v23 = vld [vmem:[%s2250_s17 + $0x68] sm:$0xff]  ;;  %274 = vst [vmem:[%s2246_s15 + $0x28] sm:$0xff] %v273_v22 }
  0x3a   : >> { %v237_v4 = vld [vmem:[%s2250_s17 + $0x80] sm:$0xff]  ;;  %236 = vst [vmem:[%s2246_s15 + $0x30] sm:$0xff] %v235_v3  ;;  %s312_s7 = smul.u32 640, %s3032_s16  ;;  %276 = vst [vmem:[%s2246_s15 + $0x38] sm:$0xff] %v275_v23  ;;  %v277_v24 = vld [vmem:[%s2250_s17 + $0x88] sm:$0xff]  ;;  %s3010_s30 = smov %s3032_s16 }
  0x3b   : >> { %v239_v5 = vld [vmem:[%s2250_s17 + $0xa0] sm:$0xff]  ;;  %238 = vst [vmem:[%s2246_s15 + $0x40] sm:$0xff] %v237_v4  ;;  %s313_s9 = smul.u32 320, %s3032_s16  ;;  %v279_v25 = vld [vmem:[%s2250_s17 + $0xa8] sm:$0xff]  ;;  %278 = vst [vmem:[%s2246_s15 + $0x48] sm:$0xff] %v277_v24 }
  0x3c   : >> { %240 = vst [vmem:[%s2246_s15 + $0x50] sm:$0xff] %v239_v5  ;;  %v241_v6 = vld [vmem:[%s2250_s17 + $0xc0] sm:$0xff]  ;;  %s2509_s10 = scalar_lea.vmem %s2430_s28, %s312_s7   ;;  %v281_v26 = vld [vmem:[%s2250_s17 + $0xc8] sm:$0xff]  ;;  %280 = vst [vmem:[%s2246_s15 + $0x58] sm:$0xff] %v279_v25 }
  0x3d   : >> { %v243_v7 = vld [vmem:[%s2250_s17 + $0xe0] sm:$0xff]  ;;  %242 = vst [vmem:[%s2246_s15 + $0x60] sm:$0xff] %v241_v6  ;;  %s2518_s6 = scalar_lea.vmem %s2432_s27, %s313_s9 [#allocation3]   ;;  %282 = vst [vmem:[%s2246_s15 + $0x68] sm:$0xff] %v281_v26  ;;  %v283_v27 = vld [vmem:[%s2250_s17 + $0xe8] sm:$0xff] }
  0x3e   : >> { %v245_v8 = vld [vmem:[%s2250_s17 + $0x100] sm:$0xff]  ;;  %244 = vst [vmem:[%s2246_s15 + $0x70] sm:$0xff] %v243_v7  ;;  %v285_v28 = vld [vmem:[%s2250_s17 + $0x108] sm:$0xff]  ;;  %284 = vst [vmem:[%s2246_s15 + $0x78] sm:$0xff] %v283_v27 }
  0x3f   : >> { %246 = vst [vmem:[%s2246_s15 + $0x80] sm:$0xff] %v245_v8  ;;  %v247_v9 = vld [vmem:[%s2250_s17 + $0x120] sm:$0xff]  ;;  %v287_v29 = vld [vmem:[%s2250_s17 + $0x128] sm:$0xff]  ;;  %286 = vst [vmem:[%s2246_s15 + $0x88] sm:$0xff] %v285_v28 }
  0x40   : >> { %v249_v10 = vld [vmem:[%s2250_s17 + $0x140] sm:$0xff]  ;;  %248 = vst [vmem:[%s2246_s15 + $0x90] sm:$0xff] %v247_v9  ;;  %288 = vst [vmem:[%s2246_s15 + $0x98] sm:$0xff] %v287_v29  ;;  %v289_v30 = vld [vmem:[%s2250_s17 + $0x148] sm:$0xff] }
  0x41   : >> { %v251_v11 = vld [vmem:[%s2250_s17 + $0x160] sm:$0xff]  ;;  %250 = vst [vmem:[%s2246_s15 + $0xa0] sm:$0xff] %v249_v10  ;;  %v291_v31 = vld [vmem:[%s2250_s17 + $0x168] sm:$0xff]  ;;  %290 = vst [vmem:[%s2246_s15 + $0xa8] sm:$0xff] %v289_v30 }
  0x42   : >> { %252 = vst [vmem:[%s2246_s15 + $0xb0] sm:$0xff] %v251_v11  ;;  %v253_v12 = vld [vmem:[%s2250_s17 + $0x180] sm:$0xff]  ;;  %v293_v32 = vld [vmem:[%s2250_s17 + $0x188] sm:$0xff]  ;;  %292 = vst [vmem:[%s2246_s15 + $0xb8] sm:$0xff] %v291_v31 }
  0x43   : >> { %v255_v13 = vld [vmem:[%s2250_s17 + $0x1a0] sm:$0xff]  ;;  %254 = vst [vmem:[%s2246_s15 + $0xc0] sm:$0xff] %v253_v12  ;;  %294 = vst [vmem:[%s2246_s15 + $0xc8] sm:$0xff] %v293_v32  ;;  %v295_v33 = vld [vmem:[%s2250_s17 + $0x1a8] sm:$0xff] }
  0x44   : >> { %v257_v14 = vld [vmem:[%s2250_s17 + $0x1c0] sm:$0xff]  ;;  %256 = vst [vmem:[%s2246_s15 + $0xd0] sm:$0xff] %v255_v13  ;;  %v297_v34 = vld [vmem:[%s2250_s17 + $0x1c8] sm:$0xff]  ;;  %296 = vst [vmem:[%s2246_s15 + $0xd8] sm:$0xff] %v295_v33 }
  0x45   : >> { %258 = vst [vmem:[%s2246_s15 + $0xe0] sm:$0xff] %v257_v14  ;;  %v259_v15 = vld [vmem:[%s2250_s17 + $0x1e0] sm:$0xff]  ;;  %v299_v35 = vld [vmem:[%s2250_s17 + $0x1e8] sm:$0xff]  ;;  %298 = vst [vmem:[%s2246_s15 + $0xe8] sm:$0xff] %v297_v34 }
  0x46   : >> { %v261_v16 = vld [vmem:[%s2250_s17 + $0x200] sm:$0xff]  ;;  %260 = vst [vmem:[%s2246_s15 + $0xf0] sm:$0xff] %v259_v15  ;;  %300 = vst [vmem:[%s2246_s15 + $0xf8] sm:$0xff] %v299_v35  ;;  %v301_v36 = vld [vmem:[%s2250_s17 + $0x208] sm:$0xff]  ;;  %225 = sbr.rel (!%p222_p1) target bundleno = 54 (0x36), region = 178 }
  0x47   : >> { %v263_v17 = vld [vmem:[%s2250_s17 + $0x220] sm:$0xff]  ;;  %262 = vst [vmem:[%s2246_s15 + $0x100] sm:$0xff] %v261_v16  ;;  %v303_v37 = vld [vmem:[%s2250_s17 + $0x228] sm:$0xff]  ;;  %302 = vst [vmem:[%s2246_s15 + $0x108] sm:$0xff] %v301_v36 }
  0x48   : >> { %264 = vst [vmem:[%s2246_s15 + $0x110] sm:$0xff] %v263_v17  ;;  %v265_v18 = vld [vmem:[%s2250_s17 + $0x240] sm:$0xff]  ;;  %v305_v38 = vld [vmem:[%s2250_s17 + $0x248] sm:$0xff]  ;;  %304 = vst [vmem:[%s2246_s15 + $0x118] sm:$0xff] %v303_v37 }
  0x49   : >> { %v267_v19 = vld [vmem:[%s2250_s17 + $0x260] sm:$0xff]  ;;  %266 = vst [vmem:[%s2246_s15 + $0x120] sm:$0xff] %v265_v18  ;;  %306 = vst [vmem:[%s2246_s15 + $0x128] sm:$0xff] %v305_v38  ;;  %v307_v39 = vld [vmem:[%s2250_s17 + $0x268] sm:$0xff]  ;;  %s3009_s17 = smov %s2509_s10 }
  0x4a   : >> { %268 = vst [vmem:[%s2246_s15 + $0x130] sm:$0xff] %v267_v19  ;;  %308 = vst [vmem:[%s2246_s15 + $0x138] sm:$0xff] %v307_v39  ;;  %s3008_s15 = smov %s2518_s6 }
  0x4b PF: > { %2038 = sdivrem.u32 %s3030_s29, 20 }
  0x4c   : > { %s1617_s7 = smul.u32 640, %s2435_s14 }
  0x4d   : > { %s1618_s9 = smul.u32 320, %s2435_s14 }
  0x4e   : > { %s2566_s0 = scalar_lea.vmem %s2430_s28, %s1617_s7  }
  0x4f   : > { %s2569_s25 = scalar_lea.vmem %s2432_s27, %s1618_s9 [#allocation3]  }
  0x54   : > { %s2571_s6 = spop.drf %2038 }
  0x55   : > { %p1619_p2 = scmp.le.s32.totalorder %s2571_s6, 0 }
  0x56   : > { %s2260_s15 = smov (!%p1619_p2), %s2569_s25   ;;  %s2264_s17 = smov (!%p1619_p2), %s2566_s0  }
  0x57   : > { %1530 = sbr.rel (%p1619_p2) target bundleno = 100 (0x64), region = 183  ;;  %s2268_s30 = smov (!%p1619_p2), 0  }
  0x58   : > { %s2272_s8 = smov (!%p1619_p2), 0  }
  0x5c LB: >> { %v332_v40 = vld [vmem:[%s2266_s17] sm:$0xff]  ;;  %v334_v41 = vld [vmem:[%s2266_s17 + $0x8] sm:$0xff]  ;;  %s336_s27 = sadd.s32 1, %s2270_s30  ;;  %s326_s8 = sadd.s32 1, %s2274_s8   ;;  %s2274_s8 = sphi %s2272_s8, %s326_s8   ;;  %s2270_s30 = sphi %s2268_s30, %s2269_s30   ;;  %s2266_s17 = sphi %s2264_s17, %s341_s17   ;;  %s2262_s15 = sphi %s2260_s15, %s342_s15  }
  0x5d   : >> { %333 = vst [vmem:[%s2262_s15] sm:$0xff] %v332_v40  ;;  %335 = vst [vmem:[%s2262_s15 + $0x8] sm:$0xff] %v334_v41  ;;  %p337_p3 = scmp.ge.s32.totalorder %s336_s27, %s2571_s6  ;;  %p325_p4 = scmp.ge.s32.totalorder %s326_s8, %s2571_s6 }
  0x5f   : >> { %s3034_s27 = smov (%p337_p3, %s336_s27), 0  ;;  %328 = sbr.rel (!%p325_p4) target bundleno = 92 (0x5c), region = 189 }
  0x60   : >> { %s1620_s28 = sshll.u32 %s3034_s27, 5  ;;  %s1621_s29 = sshll.u32 %s3034_s27, 4 }
  0x61   : >> { %s341_s17 = scalar_lea.vmem %s2566_s0, %s1620_s28   ;;  %s342_s15 = scalar_lea.vmem %s2569_s25, %s1621_s29 [#allocation3]  }
  0x62   : >> { %s2269_s30 = smov %s3034_s27  }
  0x64 PF: > { %p1622_p5 = scmp.ge.s32.totalorder %s2242_s26, 1  ;;  %p356_p6 = scmp.lt.s32.totalorder %s2242_s26, 5 }
  0x66   : > { %p357_p7 = pnand %p1622_p5, %p356_p6 }
  0x67   : > { %s363_s14 = sand.u32 (!%p357_p7), 1, %s2218_s20   ;;  %s391_s16 = sand.u32 (!%p357_p7), 1, %s2210_s18  }
  0x68   : > { %360 = sbr.rel (%p357_p7) target bundleno = 733 (0x2dd), region = 66  ;;  %s1623_s7 = sshll.u32 (!%p357_p7), %s2226_s22, 5 }
  0x69   : > { %s1831_s10 = smul.u32 (!%p357_p7), 320, %s363_s14  ;;  %p402_p8 = scmp.lt.s32.totalorder (!%p357_p7), %s1623_s7, 63 }
  0x6a   : > { %s1832_s9 = smul.u32 (!%p357_p7), 160, %s391_s16  ;;  %p1625_p10 = scmp.ne.s32.totalorder (!%p357_p7), %s2226_s22, 0 }
  0x6b   : > { %s2590_s17 = scalar_lea.vmem (!%p357_p7), [#allocation3], %s1831_s10 }
  0x6c   : > { %s2592_s30 = scalar_lea.vmem (!%p357_p7), [#allocation4], %s1832_s9  }
  0x6d   : > { %s3036_s7 = smov (!%p402_p8, %s1623_s7), 63  ;;  %416 = sbr.rel (%p1625_p10) target bundleno = 125 (0x7d), region = 74 }
  0x6e   : > { %s1624_s0 = sshll.u32 %s3036_s7, 2 }
  0x6f   : > { %s2588_s15 = scalar_lea.vmem %s2991_s1, %s1624_s0 }
  0x72   : > { %v2308_v42 = vmov 0.0  }
  0x73   : > { %417 = vst [vmem:[#allocation2] sm:$0xff] %v2308_v42  ;;  %418 = vst [vmem:[#allocation2 + $0x38] sm:$0xff] %v2308_v42 }
  0x74   : > { %419 = vst [vmem:[#allocation2 + $0x50] sm:$0xff] %v2308_v42  ;;  %420 = vst [vmem:[#allocation2 + $0x18] sm:$0xff] %v2308_v42 }
  0x75   : > { %421 = vst [vmem:[#allocation2 + $0x30] sm:$0xff] %v2308_v42  ;;  %422 = vst [vmem:[#allocation2 + $0x68] sm:$0xff] %v2308_v42 }
  0x76   : > { %423 = vst [vmem:[#allocation2 + $0x78] sm:$0xff] %v2308_v42  ;;  %424 = vst [vmem:[#allocation2 + $0x80] sm:$0xff] %v2308_v42 }
  0x77   : > { %425 = vst [vmem:[#allocation2 + $0x8] sm:$0xff] %v2308_v42  ;;  %426 = vst [vmem:[#allocation2 + $0x88] sm:$0xff] %v2308_v42 }
  0x78   : > { %427 = vst [vmem:[#allocation2 + $0x28] sm:$0xff] %v2308_v42  ;;  %428 = vst [vmem:[#allocation2 + $0x40] sm:$0xff] %v2308_v42 }
  0x79   : > { %429 = vst [vmem:[#allocation2 + $0x58] sm:$0xff] %v2308_v42  ;;  %430 = vst [vmem:[#allocation2 + $0x10] sm:$0xff] %v2308_v42 }
  0x7a   : > { %431 = vst [vmem:[#allocation2 + $0x98] sm:$0xff] %v2308_v42  ;;  %432 = vst [vmem:[#allocation2 + $0x60] sm:$0xff] %v2308_v42 }
  0x7b   : > { %433 = vst [vmem:[#allocation2 + $0x20] sm:$0xff] %v2308_v42  ;;  %434 = vst [vmem:[#allocation2 + $0x48] sm:$0xff] %v2308_v42 }
  0x7c   : > { %435 = vst [vmem:[#allocation2 + $0x70] sm:$0xff] %v2308_v42  ;;  %436 = vst [vmem:[#allocation2 + $0x90] sm:$0xff] %v2308_v42 }
  0x7d PF: > { %v2040_v43 = vld [vmem:[%s2588_s15 + $0x78] sm:$0xff]   ;;  %v2042_v45 = vld [vmem:[%s2588_s15 + $0x70] sm:$0xff]   ;;  %v2044_v47 = vld [vmem:[%s2588_s15 + $0x68] sm:$0xff]   ;;  %p1642_p11 = scmp.ne.s32.totalorder %s2226_s22, 1 }
  0x7e   : > { %v2041_v44 = vld [vmem:[%s2588_s15 + $0x38] sm:$0xff]   ;;  %1668 = vmatprep.subr.bf16.mxu0 %v2040_v43  ;;  %1798 = vmatprep.subr.bf16.mxu1 %v2040_v43  ;;  %v2043_v46 = vld [vmem:[%s2588_s15 + $0x30] sm:$0xff]   ;;  %v2045_v48 = vld [vmem:[%s2588_s15 + $0x28] sm:$0xff]  }
  0x7f   : > { %1669 = vmatpush3.bf16.msra.mxu0 %v2041_v44  ;;  %1806 = vmatpush3.bf16.msra.mxu1 %v2041_v44  ;;  %v2046_v49 = vld [vmem:[%s2588_s15 + $0x60] sm:$0xff]   ;;  %v2048_v51 = vld [vmem:[%s2588_s15 + $0x58] sm:$0xff]   ;;  %v2050_v53 = vld [vmem:[%s2588_s15 + $0x50] sm:$0xff]  }
  0x80   : > { %1670 = vmatprep.subr.bf16.mxu0 %v2042_v45  ;;  %1799 = vmatprep.subr.bf16.mxu1 %v2042_v45  ;;  %v2047_v50 = vld [vmem:[%s2588_s15 + $0x20] sm:$0xff]   ;;  %v2049_v52 = vld [vmem:[%s2588_s15 + $0x18] sm:$0xff]   ;;  %v438_v54 = vld [vmem:[%s2590_s17 + $0x8] sm:$0xff] }
  0x81   : > { %v440_v55 = vld [vmem:[%s2590_s17 + $0x18] sm:$0xff]  ;;  %v458_v56 = vld [vmem:[%s2590_s17 + $0xa8] sm:$0xff]  ;;  %v2051_v60 = vld [vmem:[%s2588_s15 + $0x10] sm:$0xff]  }
  0x82   : > { %v478_v57 = vpack.c.bf16 %v440_v55, %v438_v54  ;;  %v460_v58 = vld [vmem:[%s2590_s17 + $0xb8] sm:$0xff]  ;;  %v2052_v61 = vld [vmem:[%s2588_s15 + $0x48] sm:$0xff]   ;;  %v2054_v63 = vld [vmem:[%s2588_s15 + $0x40] sm:$0xff]  }
  0x83   : > { %1671 = vmatpush3.bf16.msra.mxu0 %v2043_v46  ;;  %1807 = vmatpush3.bf16.msra.mxu1 %v2043_v46  ;;  %v488_v59 = vpack.c.bf16 %v460_v58, %v458_v56  ;;  %v2053_v62 = vld [vmem:[%s2588_s15 + $0x8] sm:$0xff]   ;;  %v2055_v0 = vld [vmem:[%s2588_s15] sm:$0xff]   ;;  %v439_v2 = vld [vmem:[%s2590_s17 + $0x10] sm:$0xff] }
  0x84   : > { %1672 = vmatprep.subr.bf16.mxu0 %v2044_v47  ;;  %1800 = vmatprep.subr.bf16.mxu1 %v2044_v47  ;;  %v437_v1 = vld [vmem:[%s2590_s17] sm:$0xff]  ;;  %v459_v4 = vld [vmem:[%s2590_s17 + $0xb0] sm:$0xff]  ;;  %v442_v5 = vld [vmem:[%s2590_s17 + $0x28] sm:$0xff] }
  0x85   : > { %677 = vmatprep.mubr.bf16.mxu0 %v478_v57  ;;  %717 = vmatprep.mubr.bf16.mxu1 %v488_v59  ;;  %v457_v3 = vld [vmem:[%s2590_s17 + $0xa0] sm:$0xff]  ;;  %v444_v6 = vld [vmem:[%s2590_s17 + $0x38] sm:$0xff]  ;;  %v462_v7 = vld [vmem:[%s2590_s17 + $0xc8] sm:$0xff]  ;;  %v477_v9 = vpack.c.bf16 %v439_v2, %v437_v1 }
  0x86   : > { %v464_v8 = vld [vmem:[%s2590_s17 + $0xd8] sm:$0xff]  ;;  %v487_v10 = vpack.c.bf16 %v459_v4, %v457_v3  ;;  %v480_v11 = vpack.c.bf16 %v444_v6, %v442_v5  ;;  %v441_v13 = vld [vmem:[%s2590_s17 + $0x20] sm:$0xff]  ;;  %v443_v14 = vld [vmem:[%s2590_s17 + $0x30] sm:$0xff] }
  0x87   : > { %1673 = vmatpush3.bf16.msra.mxu0 %v2045_v48  ;;  %1808 = vmatpush3.bf16.msra.mxu1 %v2045_v48  ;;  %v490_v12 = vpack.c.bf16 %v464_v8, %v462_v7  ;;  %v461_v15 = vld [vmem:[%s2590_s17 + $0xc0] sm:$0xff]  ;;  %v463_v16 = vld [vmem:[%s2590_s17 + $0xd0] sm:$0xff]  ;;  %v446_v17 = vld [vmem:[%s2590_s17 + $0x48] sm:$0xff]  ;;  %v479_v21 = vpack.c.bf16 %v443_v14, %v441_v13 }
  0x88   : > { %1674 = vmatprep.subr.bf16.mxu0 %v2046_v49  ;;  %1801 = vmatprep.subr.bf16.mxu1 %v2046_v49  ;;  %v448_v18 = vld [vmem:[%s2590_s17 + $0x58] sm:$0xff]  ;;  %v466_v19 = vld [vmem:[%s2590_s17 + $0xe8] sm:$0xff]  ;;  %v489_v22 = vpack.c.bf16 %v463_v16, %v461_v15  ;;  %v445_v25 = vld [vmem:[%s2590_s17 + $0x40] sm:$0xff] }
  0x89   : > { %v468_v20 = vld [vmem:[%s2590_s17 + $0xf8] sm:$0xff]  ;;  %v482_v23 = vpack.c.bf16 %v448_v18, %v446_v17  ;;  %v447_v26 = vld [vmem:[%s2590_s17 + $0x50] sm:$0xff]  ;;  %v465_v27 = vld [vmem:[%s2590_s17 + $0xe0] sm:$0xff] }
  0x8a   : > { %v492_v24 = vpack.c.bf16 %v468_v20, %v466_v19  ;;  %v467_v28 = vld [vmem:[%s2590_s17 + $0xf0] sm:$0xff]  ;;  %v450_v29 = vld [vmem:[%s2590_s17 + $0x68] sm:$0xff]  ;;  %v452_v30 = vld [vmem:[%s2590_s17 + $0x78] sm:$0xff]  ;;  %v481_v33 = vpack.c.bf16 %v447_v26, %v445_v25 }
  0x8b   : > { %1675 = vmatpush3.bf16.msra.mxu0 %v2047_v50  ;;  %1809 = vmatpush3.bf16.msra.mxu1 %v2047_v50  ;;  %v470_v31 = vld [vmem:[%s2590_s17 + $0x108] sm:$0xff]  ;;  %v472_v32 = vld [vmem:[%s2590_s17 + $0x118] sm:$0xff]  ;;  %v491_v34 = vpack.c.bf16 %v467_v28, %v465_v27  ;;  %v484_v35 = vpack.c.bf16 %v452_v30, %v450_v29  ;;  %v449_v37 = vld [vmem:[%s2590_s17 + $0x60] sm:$0xff] }
  0x8c   : > { %1676 = vmatprep.subr.bf16.mxu0 %v2048_v51  ;;  %1802 = vmatprep.subr.bf16.mxu1 %v2048_v51  ;;  %v494_v36 = vpack.c.bf16 %v472_v32, %v470_v31  ;;  %v451_v38 = vld [vmem:[%s2590_s17 + $0x70] sm:$0xff]  ;;  %v469_v39 = vld [vmem:[%s2590_s17 + $0x100] sm:$0xff]  ;;  %v454_v41 = vld [vmem:[%s2590_s17 + $0x88] sm:$0xff] }
  0x8d   : > { %v471_v40 = vld [vmem:[%s2590_s17 + $0x110] sm:$0xff]  ;;  %v456_v42 = vld [vmem:[%s2590_s17 + $0x98] sm:$0xff]  ;;  %v474_v43 = vld [vmem:[%s2590_s17 + $0x128] sm:$0xff]  ;;  %v483_v45 = vpack.c.bf16 %v451_v38, %v449_v37 }
  0x8e   : > { %v476_v44 = vld [vmem:[%s2590_s17 + $0x138] sm:$0xff]  ;;  %v493_v46 = vpack.c.bf16 %v471_v40, %v469_v39  ;;  %v486_v47 = vpack.c.bf16 %v456_v42, %v454_v41  ;;  %v453_v49 = vld [vmem:[%s2590_s17 + $0x80] sm:$0xff]  ;;  %v455_v50 = vld [vmem:[%s2590_s17 + $0x90] sm:$0xff] }
  0x8f   : > { %1677 = vmatpush3.bf16.msra.mxu0 %v2049_v52  ;;  %1810 = vmatpush3.bf16.msra.mxu1 %v2049_v52  ;;  %v496_v48 = vpack.c.bf16 %v476_v44, %v474_v43  ;;  %v473_v51 = vld [vmem:[%s2590_s17 + $0x120] sm:$0xff]  ;;  %v475_v52 = vld [vmem:[%s2590_s17 + $0x130] sm:$0xff]  ;;  %v507_v59 = vld [vmem:[#allocation2 + $0x28] sm:$0xff] }
  0x90   : > { %1678 = vmatprep.subr.bf16.mxu0 %v2050_v53  ;;  %1803 = vmatprep.subr.bf16.mxu1 %v2050_v53  ;;  %v485_v53 = vpack.c.bf16 %v455_v50, %v453_v49  ;;  %v495_v54 = vpack.c.bf16 %v475_v52, %v473_v51  ;;  %v497_v57 = vld [vmem:[#allocation2] sm:$0xff]  ;;  %v498_v3 = vld [vmem:[#allocation2 + $0x38] sm:$0xff]  ;;  %v499_v13 = vld [vmem:[#allocation2 + $0x50] sm:$0xff] }
  0x91   : > { %v508_v5 = vld [vmem:[#allocation2 + $0x40] sm:$0xff]  ;;  %v509_v15 = vld [vmem:[#allocation2 + $0x58] sm:$0xff]  ;;  %v510_v25 = vld [vmem:[#allocation2 + $0x10] sm:$0xff] }
  0x92   : > { %v502_v43 = vld [vmem:[#allocation2 + $0x68] sm:$0xff] }
  0x93   : > { %1679 = vmatpush3.bf16.msra.mxu0 %v2051_v60  ;;  %1811 = vmatpush3.bf16.msra.mxu1 %v2051_v60 }
  0x94   : > { %1680 = vmatprep.subr.bf16.mxu0 %v2052_v61  ;;  %1804 = vmatprep.subr.bf16.mxu1 %v2052_v61 }
  0x97   : > { %1681 = vmatpush3.bf16.msra.mxu0 %v2053_v62  ;;  %1812 = vmatpush3.bf16.msra.mxu1 %v2053_v62 }
  0x98   : > { %1682 = vmatprep.subr.bf16.mxu0 %v2054_v63  ;;  %1805 = vmatprep.subr.bf16.mxu1 %v2054_v63 }
  0x9b   : > { %1683 = vmatpush3.bf16.msra.mxu0 %v2055_v0  ;;  %1813 = vmatpush3.bf16.msra.mxu1 %v2055_v0 }
  0x9e   : > { %678 = vmatmul.mubr.bf16.vlgmr.msra.gmra.mxu0 %v477_v9  ;;  %718 = vmatmul.mubr.bf16.vlgmr.msra.gmra.mxu1 %v487_v10 }
  0x9f   : > { %685 = vmatprep.mubr.bf16.mxu0 %v480_v11  ;;  %725 = vmatprep.mubr.bf16.mxu1 %v490_v12 }
  0xa6   : > { %686 = vmatmul.mubr.bf16.gmra.mxu0 %v479_v21  ;;  %726 = vmatmul.mubr.bf16.gmra.mxu1 %v489_v22 }
  0xa7   : > { %693 = vmatprep.mubr.bf16.mxu0 %v482_v23  ;;  %733 = vmatprep.mubr.bf16.mxu1 %v492_v24  ;;  %v500_v23 = vld [vmem:[#allocation2 + $0x18] sm:$0xff] }
  0xae   : > { %694 = vmatmul.mubr.bf16.gmra.mxu0 %v481_v33  ;;  %734 = vmatmul.mubr.bf16.gmra.mxu1 %v491_v34  ;;  %v501_v33 = vld [vmem:[#allocation2 + $0x30] sm:$0xff] }
  0xaf   : > { %701 = vmatprep.mubr.bf16.mxu0 %v484_v35  ;;  %741 = vmatprep.mubr.bf16.mxu1 %v494_v36  ;;  %v511_v35 = vld [vmem:[#allocation2 + $0x98] sm:$0xff] }
  0xb6   : > { %702 = vmatmul.mubr.bf16.gmra.mxu0 %v483_v45  ;;  %742 = vmatmul.mubr.bf16.gmra.mxu1 %v493_v46  ;;  %v512_v45 = vld [vmem:[#allocation2 + $0x60] sm:$0xff] }
  0xb7   : > { %709 = vmatprep.mubr.bf16.mxu0 %v486_v47  ;;  %749 = vmatprep.mubr.bf16.mxu1 %v496_v48 }
  0xbe   : > { %710 = vmatmul.mubr.bf16.gmra.mxu0 %v485_v53  ;;  %750 = vmatmul.mubr.bf16.gmra.mxu1 %v495_v54  ;;  %v503_v53 = vld [vmem:[#allocation2 + $0x78] sm:$0xff] }
 0x15e   : > { %v1684_v55 = vpop.f32.mrf.mxu0  ;;  %v1714_v56 = vpop.f32.mrf.mxu1 }
 0x160   : > { %v1685_v58 = vpop.f32.mrf.mxu0  ;;  %v1715_v60 = vpop.f32.mrf.mxu1 }
 0x161   : > { %v1686_v61 = vadd.f32 %v1685_v58, %v1684_v55  ;;  %v1716_v62 = vadd.f32 %v1715_v60, %v1714_v56  ;;  %v513_v55 = vld [vmem:[#allocation2 + $0x20] sm:$0xff] }
 0x162   : > { %v1687_v63 = vpop.f32.mrf.mxu0  ;;  %v1717_v0 = vpop.f32.mrf.mxu1 }
 0x163   : > { %v758_v1 = vadd.f32 %v1686_v61, %v497_v57  ;;  %v768_v2 = vadd.f32 %v1716_v62, %v507_v59 }
 0x164   : > { %v1688_v4 = vpop.f32.mrf.mxu0  ;;  %v1718_v6 = vpop.f32.mrf.mxu1 }
 0x165   : > { %778 = vst [vmem:[#allocation2] sm:$0xff] %v758_v1  ;;  %788 = vst [vmem:[#allocation2 + $0x28] sm:$0xff] %v768_v2  ;;  %v1689_v7 = vadd.f32 %v1688_v4, %v1687_v63  ;;  %v1719_v8 = vadd.f32 %v1718_v6, %v1717_v0  ;;  %v504_v63 = vld [vmem:[#allocation2 + $0x80] sm:$0xff]  ;;  %v514_v1 = vld [vmem:[#allocation2 + $0x48] sm:$0xff] }
 0x166   : > { %v1690_v9 = vpop.f32.mrf.mxu0  ;;  %v1720_v10 = vpop.f32.mrf.mxu1 }
 0x167   : > { %v759_v11 = vadd.f32 %v1689_v7, %v498_v3  ;;  %v769_v12 = vadd.f32 %v1719_v8, %v508_v5 }
 0x168   : > { %v1691_v14 = vpop.f32.mrf.mxu0  ;;  %v1721_v16 = vpop.f32.mrf.mxu1 }
 0x169   : > { %779 = vst [vmem:[#allocation2 + $0x38] sm:$0xff] %v759_v11  ;;  %789 = vst [vmem:[#allocation2 + $0x40] sm:$0xff] %v769_v12  ;;  %v1692_v17 = vadd.f32 %v1691_v14, %v1690_v9  ;;  %v1722_v18 = vadd.f32 %v1721_v16, %v1720_v10  ;;  %v505_v9 = vld [vmem:[#allocation2 + $0x8] sm:$0xff]  ;;  %v515_v11 = vld [vmem:[#allocation2 + $0x70] sm:$0xff] }
 0x16a   : > { %v1693_v19 = vpop.f32.mrf.mxu0  ;;  %v1723_v20 = vpop.f32.mrf.mxu1 }
 0x16b   : > { %v760_v21 = vadd.f32 %v1692_v17, %v499_v13  ;;  %v770_v22 = vadd.f32 %v1722_v18, %v509_v15 }
 0x16c   : > { %v1694_v24 = vpop.f32.mrf.mxu0  ;;  %v1724_v26 = vpop.f32.mrf.mxu1 }
 0x16d   : > { %780 = vst [vmem:[#allocation2 + $0x50] sm:$0xff] %v760_v21  ;;  %790 = vst [vmem:[#allocation2 + $0x58] sm:$0xff] %v770_v22  ;;  %v1695_v27 = vadd.f32 %v1694_v24, %v1693_v19  ;;  %v1725_v28 = vadd.f32 %v1724_v26, %v1723_v20  ;;  %v506_v19 = vld [vmem:[#allocation2 + $0x88] sm:$0xff]  ;;  %v516_v21 = vld [vmem:[#allocation2 + $0x90] sm:$0xff] }
 0x16e   : > { %v1696_v29 = vpop.f32.mrf.mxu0  ;;  %v1726_v30 = vpop.f32.mrf.mxu1 }
 0x16f   : > { %v761_v31 = vadd.f32 %v1695_v27, %v500_v23  ;;  %v771_v32 = vadd.f32 %v1725_v28, %v510_v25 }
 0x170   : > { %v1697_v34 = vpop.f32.mrf.mxu0  ;;  %v1727_v36 = vpop.f32.mrf.mxu1 }
 0x171   : > { %781 = vst [vmem:[#allocation2 + $0x18] sm:$0xff] %v761_v31  ;;  %791 = vst [vmem:[#allocation2 + $0x10] sm:$0xff] %v771_v32  ;;  %v1698_v37 = vadd.f32 %v1697_v34, %v1696_v29  ;;  %v1728_v38 = vadd.f32 %v1727_v36, %v1726_v30 }
 0x172   : > { %v1699_v39 = vpop.f32.mrf.mxu0  ;;  %v1729_v40 = vpop.f32.mrf.mxu1 }
 0x173   : > { %v762_v41 = vadd.f32 %v1698_v37, %v501_v33  ;;  %v772_v42 = vadd.f32 %v1728_v38, %v511_v35 }
 0x174   : > { %v1700_v44 = vpop.f32.mrf.mxu0  ;;  %v1730_v46 = vpop.f32.mrf.mxu1 }
 0x175   : > { %782 = vst [vmem:[#allocation2 + $0x30] sm:$0xff] %v762_v41  ;;  %792 = vst [vmem:[#allocation2 + $0x98] sm:$0xff] %v772_v42  ;;  %v1701_v47 = vadd.f32 %v1700_v44, %v1699_v39  ;;  %v1731_v48 = vadd.f32 %v1730_v46, %v1729_v40 }
 0x176   : > { %v1702_v49 = vpop.f32.mrf.mxu0  ;;  %v1732_v50 = vpop.f32.mrf.mxu1 }
 0x177   : > { %v763_v51 = vadd.f32 %v1701_v47, %v502_v43  ;;  %v773_v52 = vadd.f32 %v1731_v48, %v512_v45 }
 0x178   : > { %v1703_v54 = vpop.f32.mrf.mxu0  ;;  %v1733_v56 = vpop.f32.mrf.mxu1 }
 0x179   : > { %783 = vst [vmem:[#allocation2 + $0x68] sm:$0xff] %v763_v51  ;;  %793 = vst [vmem:[#allocation2 + $0x60] sm:$0xff] %v773_v52  ;;  %v1704_v57 = vadd.f32 %v1703_v54, %v1702_v49  ;;  %v1734_v58 = vadd.f32 %v1733_v56, %v1732_v50 }
 0x17a   : > { %v1705_v59 = vpop.f32.mrf.mxu0  ;;  %v1735_v60 = vpop.f32.mrf.mxu1 }
 0x17b   : > { %v764_v61 = vadd.f32 %v1704_v57, %v503_v53  ;;  %v774_v62 = vadd.f32 %v1734_v58, %v513_v55 }
 0x17c   : > { %v1706_v0 = vpop.f32.mrf.mxu0  ;;  %v1736_v2 = vpop.f32.mrf.mxu1 }
 0x17d   : > { %784 = vst [vmem:[#allocation2 + $0x78] sm:$0xff] %v764_v61  ;;  %794 = vst [vmem:[#allocation2 + $0x20] sm:$0xff] %v774_v62  ;;  %v1707_v3 = vadd.f32 %v1706_v0, %v1705_v59  ;;  %v1737_v4 = vadd.f32 %v1736_v2, %v1735_v60 }
 0x17e   : > { %v1708_v5 = vpop.f32.mrf.mxu0  ;;  %v1738_v6 = vpop.f32.mrf.mxu1 }
 0x17f   : > { %v765_v7 = vadd.f32 %v1707_v3, %v504_v63  ;;  %v775_v8 = vadd.f32 %v1737_v4, %v514_v1 }
 0x180   : > { %v1709_v10 = vpop.f32.mrf.mxu0  ;;  %v1739_v12 = vpop.f32.mrf.mxu1 }
 0x181   : > { %785 = vst [vmem:[#allocation2 + $0x80] sm:$0xff] %v765_v7  ;;  %795 = vst [vmem:[#allocation2 + $0x48] sm:$0xff] %v775_v8  ;;  %v1710_v13 = vadd.f32 %v1709_v10, %v1708_v5  ;;  %v1740_v14 = vadd.f32 %v1739_v12, %v1738_v6 }
 0x182   : > { %v1711_v15 = vpop.f32.mrf.mxu0  ;;  %v1741_v16 = vpop.f32.mrf.mxu1 }
 0x183   : > { %v766_v17 = vadd.f32 %v1710_v13, %v505_v9  ;;  %v776_v18 = vadd.f32 %v1740_v14, %v515_v11 }
 0x184   : > { %v1712_v20 = vpop.f32.mrf.mxu0  ;;  %v1742_v22 = vpop.f32.mrf.mxu1 }
 0x185   : > { %786 = vst [vmem:[#allocation2 + $0x8] sm:$0xff] %v766_v17  ;;  %796 = vst [vmem:[#allocation2 + $0x70] sm:$0xff] %v776_v18  ;;  %v1713_v23 = vadd.f32 %v1712_v20, %v1711_v15  ;;  %v1743_v24 = vadd.f32 %v1742_v22, %v1741_v16  ;;  %801 = sbr.rel (%p1642_p11) target bundleno = 671 (0x29f), region = 78 }
 0x187   : > { %v767_v25 = vadd.f32 %v1713_v23, %v506_v19  ;;  %v777_v26 = vadd.f32 %v1743_v24, %v516_v21 }
 0x189   : > { %787 = vst [vmem:[#allocation2 + $0x88] sm:$0xff] %v767_v25  ;;  %797 = vst [vmem:[#allocation2 + $0x90] sm:$0xff] %v777_v26 }
 0x18a   : > { %v2056_v27 = vld [vmem:[%s2993_s3 + $0x38] sm:$0xff]   ;;  %v2057_v28 = vld [vmem:[%s2993_s3 + $0x30] sm:$0xff]   ;;  %v2058_v29 = vld [vmem:[%s2993_s3 + $0x28] sm:$0xff]  }
 0x18b   : > { %1762 = vmatprep.subr.bf16.mxu0 %v2056_v27  ;;  %1814 = vmatprep.subr.bf16.mxu1 %v2056_v27  ;;  %v2059_v30 = vld [vmem:[%s2993_s3 + $0x20] sm:$0xff]   ;;  %v803_v32 = vld [vmem:[#allocation2 + $0x38] sm:$0xff]  ;;  %v804_v36 = vld [vmem:[#allocation2 + $0x50] sm:$0xff] }
 0x18c   : > { %1763 = vmatpush3.bf16.msra.mxu0 %v2056_v27  ;;  %1822 = vmatpush3.bf16.msra.mxu1 %v2056_v27  ;;  %v802_v31 = vld [vmem:[#allocation2] sm:$0xff]  ;;  %v805_v37 = vld [vmem:[#allocation2 + $0x18] sm:$0xff]  ;;  %v815_v41 = vld [vmem:[#allocation2 + $0x10] sm:$0xff] }
 0x18d   : > { %1764 = vmatprep.subr.bf16.mxu0 %v2057_v28  ;;  %1815 = vmatprep.subr.bf16.mxu1 %v2057_v28  ;;  %v2667_v33 = vld [vmem:[%s2992_s2] ss:$0 sm:$0xff]  ;;  %v814_v38 = vld [vmem:[#allocation2 + $0x58] sm:$0xff]  ;;  %v2061_v60 = vld [vmem:[%s2993_s3 + $0x10] sm:$0xff]  }
 0x18e   : > { %v2670_v34 = vadd.f32 %v2667_v33, %v802_v31  ;;  %v2673_v35 = vadd.f32 %v2667_v33, %v803_v32  ;;  %v2676_v39 = vadd.f32 %v2667_v33, %v804_v36  ;;  %v2679_v40 = vadd.f32 %v2667_v33, %v805_v37  ;;  %v816_v45 = vld [vmem:[#allocation2 + $0x98] sm:$0xff]  ;;  %v817_v55 = vld [vmem:[#allocation2 + $0x60] sm:$0xff]  ;;  %v806_v8 = vld [vmem:[#allocation2 + $0x30] sm:$0xff] }
 0x18f   : > { %v2682_v42 = vadd.f32 %v2667_v33, %v814_v38  ;;  %v2060_v46 = vld [vmem:[%s2993_s3 + $0x18] sm:$0xff]   ;;  %v2694_v51 = vadd.f32 %v2667_v33, %v815_v41  ;;  %v2700_v56 = vadd.f32 %v2667_v33, %v816_v45  ;;  %v2715_v3 = vadd.f32 %v2667_v33, %v817_v55  ;;  %v2062_v9 = vld [vmem:[%s2993_s3 + $0x8] sm:$0xff]  }
 0x190   : > { %1765 = vmatpush3.bf16.msra.mxu0 %v2057_v28  ;;  %1823 = vmatpush3.bf16.msra.mxu1 %v2057_v28  ;;  %v869_v43 = vmul.f32 0.044715, %v2670_v34  ;;  %v870_v44 = vmul.f32 0.044715, %v2673_v35  ;;  %v871_v47 = vmul.f32 0.044715, %v2676_v39  ;;  %v2730_v20 = vadd.f32 %v2667_v33, %v806_v8 }
 0x191   : > { %1766 = vmatprep.subr.bf16.mxu0 %v2058_v29  ;;  %1816 = vmatprep.subr.bf16.mxu1 %v2058_v29  ;;  %v872_v48 = vmul.f32 0.044715, %v2679_v40  ;;  %v881_v54 = vmul.f32 0.044715, %v2682_v42  ;;  %v882_v59 = vmul.f32 0.044715, %v2694_v51 }
 0x192   : > { %v889_v49 = vmul.f32 %v869_v43, %v2670_v34  ;;  %v890_v50 = vmul.f32 %v870_v44, %v2673_v35  ;;  %v891_v52 = vmul.f32 %v871_v47, %v2676_v39  ;;  %v883_v7 = vmul.f32 0.044715, %v2700_v56  ;;  %v807_v13 = vld [vmem:[#allocation2 + $0x68] sm:$0xff]  ;;  %v808_v24 = vld [vmem:[#allocation2 + $0x78] sm:$0xff]  ;;  %v809_v28 = vld [vmem:[#allocation2 + $0x80] sm:$0xff] }
 0x193   : > { %v892_v53 = vmul.f32 %v872_v48, %v2679_v40  ;;  %v901_v63 = vmul.f32 %v881_v54, %v2682_v42  ;;  %v902_v2 = vmul.f32 %v882_v59, %v2694_v51  ;;  %v884_v17 = vmul.f32 0.044715, %v2715_v3  ;;  %v818_v43 = vld [vmem:[#allocation2 + $0x20] sm:$0xff]  ;;  %v819_v48 = vld [vmem:[#allocation2 + $0x48] sm:$0xff]  ;;  %v821_v8 = vld [vmem:[#allocation2 + $0x90] sm:$0xff] }
 0x194   : > { %1767 = vmatpush3.bf16.msra.mxu0 %v2058_v29  ;;  %1824 = vmatpush3.bf16.msra.mxu1 %v2058_v29  ;;  %v909_v57 = vmul.f32 %v889_v49, %v2670_v34  ;;  %v910_v58 = vmul.f32 %v890_v50, %v2673_v35  ;;  %v911_v61 = vmul.f32 %v891_v52, %v2676_v39  ;;  %v2737_v25 = vmul.f32 0.5, %v2670_v34  ;;  %v2063_v29 = vld [vmem:[%s2993_s3] sm:$0xff]  }
 0x195   : > { %1768 = vmatprep.subr.bf16.mxu0 %v2059_v30  ;;  %1817 = vmatprep.subr.bf16.mxu1 %v2059_v30  ;;  %v912_v62 = vmul.f32 %v892_v53, %v2679_v40  ;;  %v921_v6 = vmul.f32 %v901_v63, %v2682_v42  ;;  %v922_v12 = vmul.f32 %v902_v2, %v2694_v51  ;;  %v873_v32 = vmul.f32 0.044715, %v2730_v20  ;;  %v820_v63 = vld [vmem:[#allocation2 + $0x70] sm:$0xff] }
 0x196   : > { %v929_v0 = vadd.f32 %v909_v57, %v2670_v34  ;;  %v930_v1 = vadd.f32 %v910_v58, %v2673_v35  ;;  %v931_v4 = vadd.f32 %v911_v61, %v2676_v39  ;;  %v903_v19 = vmul.f32 %v883_v7, %v2700_v56 }
 0x197   : > { %v932_v5 = vadd.f32 %v912_v62, %v2679_v40  ;;  %v941_v16 = vadd.f32 %v921_v6, %v2682_v42  ;;  %v942_v18 = vadd.f32 %v922_v12, %v2694_v51  ;;  %v904_v22 = vmul.f32 %v884_v17, %v2715_v3 }
 0x198   : > { %1769 = vmatpush3.bf16.msra.mxu0 %v2059_v30  ;;  %1825 = vmatpush3.bf16.msra.mxu1 %v2059_v30  ;;  %v949_v10 = vmul.f32 0.7978846, %v929_v0  ;;  %v950_v11 = vmul.f32 0.7978846, %v930_v1  ;;  %v951_v14 = vmul.f32 0.7978846, %v931_v4  ;;  %v2734_v23 = vadd.f32 %v2667_v33, %v807_v13 }
 0x199   : > { %1770 = vmatprep.subr.bf16.mxu0 %v2060_v46  ;;  %1818 = vmatprep.subr.bf16.mxu1 %v2060_v46  ;;  %v952_v15 = vmul.f32 0.7978846, %v932_v5  ;;  %v961_v21 = vmul.f32 0.7978846, %v941_v16  ;;  %v962_v26 = vmul.f32 0.7978846, %v942_v18  ;;  %v923_v27 = vmul.f32 %v903_v19, %v2700_v56 }
 0x19a   : > { %2064 = vtanh.f32 %v949_v10  ;;  %v2744_v30 = vmul.f32 0.5, %v2673_v35  ;;  %v924_v31 = vmul.f32 %v904_v22, %v2715_v3  ;;  %v874_v36 = vmul.f32 0.044715, %v2734_v23 }
 0x19b   : > { %2066 = vtanh.f32 %v950_v11  ;;  %v943_v34 = vadd.f32 %v923_v27, %v2700_v56  ;;  %v2751_v37 = vadd.f32 %v2667_v33, %v808_v24  ;;  %v893_v41 = vmul.f32 %v873_v32, %v2730_v20 }
 0x19c   : > { %1771 = vmatpush3.bf16.msra.mxu0 %v2060_v46  ;;  %1826 = vmatpush3.bf16.msra.mxu1 %v2060_v46  ;;  %2068 = vtanh.f32 %v951_v14  ;;  %v944_v38 = vadd.f32 %v924_v31, %v2715_v3  ;;  %v2756_v35 = vadd.f32 %v2667_v33, %v809_v28  ;;  %v851_v44 = vmul.f32 0.5, %v2676_v39 }
 0x19d   : > { %1772 = vmatprep.subr.bf16.mxu0 %v2061_v60  ;;  %1819 = vmatprep.subr.bf16.mxu1 %v2061_v60  ;;  %2070 = vtanh.f32 %v952_v15  ;;  %v963_v45 = vmul.f32 0.7978846, %v943_v34  ;;  %v894_v46 = vmul.f32 %v874_v36, %v2734_v23  ;;  %v875_v47 = vmul.f32 0.044715, %v2751_v37 }
 0x19e   : > { %2072 = vtanh.f32 %v961_v21  ;;  %v852_v49 = vmul.f32 0.5, %v2679_v40  ;;  %v964_v50 = vmul.f32 0.7978846, %v944_v38  ;;  %v913_v52 = vmul.f32 %v893_v41, %v2730_v20 }
 0x19f   : > { %2074 = vtanh.f32 %v962_v26  ;;  %v876_v53 = vmul.f32 0.044715, %v2756_v35  ;;  %v914_v54 = vmul.f32 %v894_v46, %v2734_v23  ;;  %v895_v39 = vmul.f32 %v875_v47, %v2751_v37 }
 0x1a0   : > { %1773 = vmatpush3.bf16.msra.mxu0 %v2061_v60  ;;  %1827 = vmatpush3.bf16.msra.mxu1 %v2061_v60  ;;  %2076 = vtanh.f32 %v963_v45  ;;  %v2767_v55 = vadd.f32 %v2667_v33, %v818_v43  ;;  %v933_v57 = vadd.f32 %v913_v52, %v2730_v20  ;;  %v2772_v40 = vadd.f32 %v2667_v33, %v819_v48  ;;  %v810_v43 = vld [vmem:[#allocation2 + $0x8] sm:$0xff] }
 0x1a1   : > { %1774 = vmatprep.subr.bf16.mxu0 %v2062_v9  ;;  %1820 = vmatprep.subr.bf16.mxu1 %v2062_v9  ;;  %2078 = vtanh.f32 %v964_v50  ;;  %v896_v58 = vmul.f32 %v876_v53, %v2756_v35  ;;  %v861_v59 = vmul.f32 0.5, %v2682_v42  ;;  %v934_v60 = vadd.f32 %v914_v54, %v2734_v23  ;;  %v811_v48 = vld [vmem:[#allocation2 + $0x88] sm:$0xff] }
 0x1a2   : > { %v915_v61 = vmul.f32 %v895_v39, %v2751_v37  ;;  %v885_v62 = vmul.f32 0.044715, %v2767_v55  ;;  %v862_v0 = vmul.f32 0.5, %v2694_v51  ;;  %v953_v1 = vmul.f32 0.7978846, %v933_v57 }
 0x1a3   : > { %v916_v2 = vmul.f32 %v896_v58, %v2756_v35  ;;  %v886_v4 = vmul.f32 0.044715, %v2772_v40  ;;  %v863_v5 = vmul.f32 0.5, %v2700_v56  ;;  %v954_v6 = vmul.f32 0.7978846, %v934_v60 }
 0x1a4   : > { %1775 = vmatpush3.bf16.msra.mxu0 %v2062_v9  ;;  %1828 = vmatpush3.bf16.msra.mxu1 %v2062_v9  ;;  %v935_v7 = vadd.f32 %v915_v61, %v2751_v37  ;;  %v905_v42 = vmul.f32 %v885_v62, %v2767_v55  ;;  %2080 = vtanh.f32 %v953_v1  ;;  %v2787_v51 = vadd.f32 %v2667_v33, %v820_v63 }
 0x1a5   : > { %1776 = vmatprep.subr.bf16.mxu0 %v2063_v29  ;;  %1821 = vmatprep.subr.bf16.mxu1 %v2063_v29  ;;  %v936_v10 = vadd.f32 %v916_v2, %v2756_v35  ;;  %v906_v11 = vmul.f32 %v886_v4, %v2772_v40  ;;  %2082 = vtanh.f32 %v954_v6  ;;  %v2792_v19 = vadd.f32 %v2667_v33, %v821_v8 }
 0x1a6   : > { %v955_v14 = vmul.f32 0.7978846, %v935_v7  ;;  %v925_v56 = vmul.f32 %v905_v42, %v2767_v55  ;;  %v864_v38 = vmul.f32 0.5, %v2715_v3  ;;  %v2802_v3 = vadd.f32 %v2667_v33, %v810_v43 }
 0x1a7   : > { %v2065_v9 = vpop.eup %2064  ;;  %v956_v17 = vmul.f32 0.7978846, %v936_v10  ;;  %v926_v18 = vmul.f32 %v906_v11, %v2772_v40  ;;  %v888_v52 = vmul.f32 0.044715, %v2792_v19  ;;  %v853_v62 = vmul.f32 0.5, %v2730_v20  ;;  %v813_v10 = vld [vmem:[#allocation2 + $0x40] sm:$0xff] }
 0x1a8   : > { %1777 = vmatpush3.bf16.msra.mxu0 %v2063_v29  ;;  %1829 = vmatpush3.bf16.msra.mxu1 %v2063_v29  ;;  %v2067_v12 = vpop.eup %2066  ;;  %v989_v13 = vadd.f32 1.0, %v2065_v9  ;;  %2084 = vtanh.f32 %v955_v14  ;;  %v945_v26 = vadd.f32 %v925_v56, %v2767_v55  ;;  %v877_v63 = vmul.f32 0.044715, %v2802_v3 }
 0x1a9   : > { %v2069_v15 = vpop.eup %2068  ;;  %v990_v16 = vadd.f32 1.0, %v2067_v12  ;;  %2086 = vtanh.f32 %v956_v17  ;;  %v946_v31 = vadd.f32 %v926_v18, %v2772_v40  ;;  %v908_v58 = vmul.f32 %v888_v52, %v2792_v19 }
 0x1aa   : > { %v2071_v21 = vpop.eup %2070  ;;  %v1009_v22 = vmul.f32 %v989_v13, %v2737_v25  ;;  %v991_v24 = vadd.f32 1.0, %v2069_v15  ;;  %v965_v41 = vmul.f32 0.7978846, %v945_v26  ;;  %v854_v2 = vmul.f32 0.5, %v2734_v23 }
 0x1ab   : > { %v2073_v27 = vpop.eup %2072  ;;  %v1010_v28 = vmul.f32 %v990_v16, %v2744_v30  ;;  %v992_v29 = vadd.f32 1.0, %v2071_v21  ;;  %v966_v47 = vmul.f32 0.7978846, %v946_v31  ;;  %v887_v30 = vmul.f32 0.044715, %v2787_v51 }
 0x1ac   : > { %v2075_v32 = vpop.eup %2074  ;;  %v1011_v34 = vmul.f32 %v991_v24, %v851_v44  ;;  %v1001_v36 = vadd.f32 1.0, %v2073_v27  ;;  %2088 = vtanh.f32 %v965_v41  ;;  %v928_v6 = vmul.f32 %v908_v58, %v2792_v19 }
 0x1ad   : > { %v1029_v45 = vpack.c.bf16 %v1010_v28, %v1009_v22  ;;  %v1012_v25 = vmul.f32 %v992_v29, %v852_v49  ;;  %v1002_v46 = vadd.f32 1.0, %v2075_v32  ;;  %v2077_v53 = vpop.eup %2076  ;;  %2090 = vtanh.f32 %v966_v47 }
 0x1ae   : > { %v1021_v50 = vmul.f32 %v1001_v36, %v861_v59  ;;  %v2079_v39 = vpop.eup %2078  ;;  %v1003_v57 = vadd.f32 1.0, %v2077_v53  ;;  %v907_v49 = vmul.f32 %v887_v30, %v2787_v51  ;;  %v2807_v59 = vadd.f32 %v2667_v33, %v811_v48 }
 0x1af   : > { %1778 = vmatprep.mubr.bf16.mxu0 %v1029_v45  ;;  %v1030_v54 = vpack.c.bf16 %v1012_v25, %v1011_v34  ;;  %v1022_v44 = vmul.f32 %v1002_v46, %v862_v0  ;;  %v1004_v61 = vadd.f32 1.0, %v2079_v39  ;;  %v812_v0 = vld [vmem:[#allocation2 + $0x28] sm:$0xff]  ;;  %v855_v42 = vmul.f32 0.5, %v2751_v37 }
 0x1b0   : > { %v1023_v1 = vmul.f32 %v1003_v57, %v863_v5  ;;  %v927_v4 = vmul.f32 %v907_v49, %v2787_v51  ;;  %v878_v8 = vmul.f32 0.044715, %v2807_v59  ;;  %v897_v9 = vmul.f32 %v877_v63, %v2802_v3 }
 0x1b1   : > { %1779 = vmatmul.mubr.bf16.vlgmr.msra.gmra.mxu0 %v1030_v54  ;;  %v1035_v60 = vpack.c.bf16 %v1022_v44, %v1021_v50  ;;  %v1024_v7 = vmul.f32 %v1004_v61, %v864_v38  ;;  %v2081_v20 = vpop.eup %2080  ;;  %v856_v11 = vmul.f32 0.5, %v2756_v35  ;;  %v948_v23 = vadd.f32 %v928_v6, %v2792_v19 }
 0x1b2   : > { %v947_v5 = vadd.f32 %v927_v4, %v2787_v51  ;;  %v2821_v12 = vadd.f32 %v2667_v33, %v812_v0  ;;  %v2083_v13 = vpop.eup %2082  ;;  %v993_v56 = vadd.f32 1.0, %v2081_v20  ;;  %v898_v37 = vmul.f32 %v878_v8, %v2807_v59 }
 0x1b3   : > { %1790 = vmatprep.mubr.bf16.mxu1 %v1035_v60  ;;  %v1036_v14 = vpack.c.bf16 %v1024_v7, %v1023_v1  ;;  %v917_v15 = vmul.f32 %v897_v9, %v2802_v3  ;;  %v994_v16 = vadd.f32 1.0, %v2083_v13  ;;  %v968_v18 = vmul.f32 0.7978846, %v948_v23 }
 0x1b4   : > { %v967_v17 = vmul.f32 0.7978846, %v947_v5  ;;  %v2826_v21 = vadd.f32 %v2667_v33, %v813_v10  ;;  %v1013_v22 = vmul.f32 %v993_v56, %v853_v62  ;;  %v865_v24 = vmul.f32 0.5, %v2767_v55 }
 0x1b5   : > { %v2085_v35 = vpop.eup %2084  ;;  %1791 = vmatmul.mubr.bf16.vlgmr.msra.gmra.mxu1 %v1036_v14  ;;  %v918_v26 = vmul.f32 %v898_v37, %v2807_v59  ;;  %v937_v27 = vadd.f32 %v917_v15, %v2802_v3  ;;  %v1014_v29 = vmul.f32 %v994_v16, %v854_v2  ;;  %v879_v32 = vmul.f32 0.044715, %v2821_v12 }
 0x1b6   : > { %v2087_v28 = vpop.eup %2086  ;;  %v995_v31 = vadd.f32 1.0, %v2085_v35  ;;  %2092 = vtanh.f32 %v967_v17  ;;  %v880_v43 = vmul.f32 0.044715, %v2826_v21  ;;  %v866_v46 = vmul.f32 0.5, %v2772_v40 }
 0x1b7   : > { %v996_v34 = vadd.f32 1.0, %v2087_v28  ;;  %2094 = vtanh.f32 %v968_v18  ;;  %v938_v33 = vadd.f32 %v918_v26, %v2807_v59  ;;  %v957_v36 = vmul.f32 0.7978846, %v937_v27 }
 0x1b8   : > { %v1031_v38 = vpack.c.bf16 %v1014_v29, %v1013_v22  ;;  %v1015_v41 = vmul.f32 %v995_v31, %v855_v42  ;;  %v899_v55 = vmul.f32 %v879_v32, %v2821_v12  ;;  %v900_v30 = vmul.f32 %v880_v43, %v2826_v21 }
 0x1b9   : > { %v2089_v45 = vpop.eup %2088  ;;  %v1016_v25 = vmul.f32 %v996_v34, %v856_v11  ;;  %v958_v47 = vmul.f32 0.7978846, %v938_v33  ;;  %2096 = vtanh.f32 %v957_v36  ;;  %v867_v62 = vmul.f32 0.5, %v2787_v51 }
 0x1ba   : > { %v2091_v48 = vpop.eup %2090  ;;  %1782 = vmatprep.mubr.bf16.mxu0 %v1031_v38  ;;  %v1005_v50 = vadd.f32 1.0, %v2089_v45  ;;  %v919_v52 = vmul.f32 %v899_v55, %v2821_v12  ;;  %v920_v39 = vmul.f32 %v900_v30, %v2826_v21  ;;  %v868_v0 = vmul.f32 0.5, %v2792_v19 }
 0x1bb   : > { %v1032_v53 = vpack.c.bf16 %v1016_v25, %v1015_v41  ;;  %v1006_v54 = vadd.f32 1.0, %v2091_v48  ;;  %2098 = vtanh.f32 %v958_v47  ;;  %v857_v6 = vmul.f32 0.5, %v2802_v3 }
 0x1bc   : > { %v1025_v44 = vmul.f32 %v1005_v50, %v865_v24  ;;  %v939_v57 = vadd.f32 %v919_v52, %v2821_v12  ;;  %v940_v40 = vadd.f32 %v920_v39, %v2826_v21  ;;  %v858_v9 = vmul.f32 0.5, %v2807_v59 }
 0x1bd   : > { %1783 = vmatmul.mubr.bf16.gmra.mxu0 %v1032_v53  ;;  %v1026_v49 = vmul.f32 %v1006_v54, %v866_v46  ;;  %v859_v13 = vmul.f32 0.5, %v2821_v12  ;;  %v860_v56 = vmul.f32 0.5, %v2826_v21  ;;  %v1644_v12 = vld [vmem:[%s2994_s4] ss:$0 sm:$0xff] }
 0x1be   : > { %v959_v58 = vmul.f32 0.7978846, %v939_v57  ;;  %v960_v61 = vmul.f32 0.7978846, %v940_v40 }
 0x1bf   : > { %v1037_v60 = vpack.c.bf16 %v1026_v49, %v1025_v44 }
 0x1c0   : > { %2100 = vtanh.f32 %v959_v58 }
 0x1c1   : > { %1794 = vmatprep.mubr.bf16.mxu1 %v1037_v60  ;;  %2102 = vtanh.f32 %v960_v61 }
 0x1c3   : > { %v2093_v63 = vpop.eup %2092 }
 0x1c4   : > { %v2095_v1 = vpop.eup %2094  ;;  %v1007_v2 = vadd.f32 1.0, %v2093_v63 }
 0x1c5   : > { %v1008_v4 = vadd.f32 1.0, %v2095_v1 }
 0x1c6   : > { %v2097_v7 = vpop.eup %2096  ;;  %v1027_v42 = vmul.f32 %v1007_v2, %v867_v62 }
 0x1c7   : > { %v1028_v8 = vmul.f32 %v1008_v4, %v868_v0  ;;  %v997_v10 = vadd.f32 1.0, %v2097_v7 }
 0x1c8   : > { %v2099_v20 = vpop.eup %2098 }
 0x1c9   : > { %v1038_v11 = vpack.c.bf16 %v1028_v8, %v1027_v42  ;;  %v998_v5 = vadd.f32 1.0, %v2099_v20  ;;  %v1017_v23 = vmul.f32 %v997_v10, %v857_v6 }
 0x1cb   : > { %1795 = vmatmul.mubr.bf16.gmra.mxu1 %v1038_v11  ;;  %v1018_v51 = vmul.f32 %v998_v5, %v858_v9 }
 0x1cd   : > { %v2101_v19 = vpop.eup %2100  ;;  %v1033_v14 = vpack.c.bf16 %v1018_v51, %v1017_v23 }
 0x1ce   : > { %v999_v3 = vadd.f32 1.0, %v2101_v19  ;;  %v2103_v37 = vpop.eup %2102 }
 0x1cf   : > { %1786 = vmatprep.mubr.bf16.mxu0 %v1033_v14  ;;  %v1000_v15 = vadd.f32 1.0, %v2103_v37 }
 0x1d0   : > { %v1019_v59 = vmul.f32 %v999_v3, %v859_v13 }
 0x1d1   : > { %v1020_v16 = vmul.f32 %v1000_v15, %v860_v56 }
 0x1d3   : > { %v1034_v17 = vpack.c.bf16 %v1020_v16, %v1019_v59 }
 0x1d5   : > { %1787 = vmatmul.mubr.bf16.gmra.mxu0 %v1034_v17 }
 0x271   : > { %v1780_v18 = vpop.f32.mrf.mxu0 }
 0x272   : > { %v1153_v35 = vadd.f32 %v1780_v18, %v1644_v12 }
 0x273   : > { %v1144_v22 = vpop.f32.mrf.mxu0 }
 0x274   : > { %1225 = vst [vmem:[%s2592_s30 + $0x10] sm:$0xff] %v1153_v35  ;;  %v1145_v21 = vadd.f32 %v1644_v12, %v1144_v22 }
 0x275   : > { %v1781_v24 = vpop.f32.mrf.mxu0  ;;  %v1792_v27 = vpop.f32.mrf.mxu1 }
 0x276   : > { %1223 = vst [vmem:[%s2592_s30] sm:$0xff] %v1145_v21  ;;  %v1156_v26 = vadd.f32 %v1781_v24, %v1644_v12  ;;  %v1201_v29 = vadd.f32 %v1792_v27, %v1644_v12 }
 0x277   : > { %v1147_v28 = vpop.f32.mrf.mxu0  ;;  %v1192_v32 = vpop.f32.mrf.mxu1 }
 0x278   : > { %1226 = vst [vmem:[%s2592_s30 + $0x18] sm:$0xff] %v1156_v26  ;;  %v1148_v31 = vadd.f32 %v1644_v12, %v1147_v28  ;;  %1237 = vst [vmem:[%s2592_s30 + $0x70] sm:$0xff] %v1201_v29  ;;  %v1193_v34 = vadd.f32 %v1644_v12, %v1192_v32 }
 0x279   : > { %v1793_v33 = vpop.f32.mrf.mxu1 }
 0x27a   : > { %1224 = vst [vmem:[%s2592_s30 + $0x8] sm:$0xff] %v1148_v31  ;;  %1235 = vst [vmem:[%s2592_s30 + $0x60] sm:$0xff] %v1193_v34  ;;  %v1204_v36 = vadd.f32 %v1793_v33, %v1644_v12 }
 0x27b   : > { %v1195_v38 = vpop.f32.mrf.mxu1 }
 0x27c   : > { %1238 = vst [vmem:[%s2592_s30 + $0x78] sm:$0xff] %v1204_v36  ;;  %v1196_v41 = vadd.f32 %v1644_v12, %v1195_v38 }
 0x27d   : > { %v1784_v43 = vpop.f32.mrf.mxu0 }
 0x27e   : > { %v1169_v55 = vadd.f32 %v1784_v43, %v1644_v12  ;;  %1236 = vst [vmem:[%s2592_s30 + $0x68] sm:$0xff] %v1196_v41 }
 0x27f   : > { %v1160_v45 = vpop.f32.mrf.mxu0 }
 0x280   : > { %1229 = vst [vmem:[%s2592_s30 + $0x30] sm:$0xff] %v1169_v55  ;;  %v1161_v25 = vadd.f32 %v1644_v12, %v1160_v45 }
 0x281   : > { %v1785_v46 = vpop.f32.mrf.mxu0 }
 0x282   : > { %1227 = vst [vmem:[%s2592_s30 + $0x20] sm:$0xff] %v1161_v25  ;;  %v1172_v47 = vadd.f32 %v1785_v46, %v1644_v12 }
 0x283   : > { %v1163_v48 = vpop.f32.mrf.mxu0 }
 0x284   : > { %1230 = vst [vmem:[%s2592_s30 + $0x38] sm:$0xff] %v1172_v47  ;;  %v1164_v50 = vadd.f32 %v1644_v12, %v1163_v48 }
 0x286   : > { %1228 = vst [vmem:[%s2592_s30 + $0x28] sm:$0xff] %v1164_v50 }
 0x28b   : > { %v1796_v30 = vpop.f32.mrf.mxu1 }
 0x28c   : > { %v1217_v52 = vadd.f32 %v1796_v30, %v1644_v12 }
 0x28d   : > { %v1208_v53 = vpop.f32.mrf.mxu1 }
 0x28e   : > { %1241 = vst [vmem:[%s2592_s30 + $0x90] sm:$0xff] %v1217_v52  ;;  %v1209_v54 = vadd.f32 %v1644_v12, %v1208_v53 }
 0x28f   : > { %v1797_v44 = vpop.f32.mrf.mxu1 }
 0x290   : > { %1239 = vst [vmem:[%s2592_s30 + $0x80] sm:$0xff] %v1209_v54  ;;  %v1220_v39 = vadd.f32 %v1797_v44, %v1644_v12 }
 0x291   : > { %v1211_v57 = vpop.f32.mrf.mxu1 }
 0x292   : > { %1242 = vst [vmem:[%s2592_s30 + $0x98] sm:$0xff] %v1220_v39  ;;  %v1212_v49 = vadd.f32 %v1644_v12, %v1211_v57 }
 0x294   : > { %1240 = vst [vmem:[%s2592_s30 + $0x88] sm:$0xff] %v1212_v49 }
 0x295   : > { %v1788_v40 = vpop.f32.mrf.mxu0 }
 0x296   : > { %v1185_v58 = vadd.f32 %v1788_v40, %v1644_v12 }
 0x297   : > { %v1176_v60 = vpop.f32.mrf.mxu0 }
 0x298   : > { %1233 = vst [vmem:[%s2592_s30 + $0x50] sm:$0xff] %v1185_v58  ;;  %v1177_v61 = vadd.f32 %v1644_v12, %v1176_v60 }
 0x299   : > { %v1789_v62 = vpop.f32.mrf.mxu0 }
 0x29a   : > { %1231 = vst [vmem:[%s2592_s30 + $0x40] sm:$0xff] %v1177_v61  ;;  %v1188_v63 = vadd.f32 %v1789_v62, %v1644_v12 }
 0x29b   : > { %v1179_v0 = vpop.f32.mrf.mxu0 }
 0x29c   : > { %1234 = vst [vmem:[%s2592_s30 + $0x58] sm:$0xff] %v1188_v63  ;;  %v1180_v1 = vadd.f32 %v1644_v12, %v1179_v0 }
 0x29e   : > { %1232 = vst [vmem:[%s2592_s30 + $0x48] sm:$0xff] %v1180_v1 }
 0x29f PF: > { %1249 = sbr.rel (!%p2407_p9) target bundleno = 733 (0x2dd), region = 82 }
 0x2a0   : > { %s1250_s27 = smul.u32 (%p2407_p9), 20, %s2230_s23 }
 0x2a1   : > { %s1667_s28 = smul.u32 (%p2407_p9), 160, %s2230_s23 }
 0x2a2   : > { %s1251_s29 = ssub.s32 (%p2407_p9), 38, %s1250_s27 }
 0x2a3   : > { %p1252_p12 = scmp.lt.s32.totalorder (%p2407_p9), %s1251_s29, 20  ;;  %s2877_s16 = scalar_lea.vmem (%p2407_p9), %s2995_s5, %s1667_s28  }
 0x2a5   : > { %s3038_s29 = smov (!%p1252_p12, %s1251_s29), 20 }
 0x2a6   : > { %s1653_s10 = sshll.u32 %s3038_s29, 7 }
 0x2a7   : > { %p1656_p13 = scmp.eq.s32.totalorder %s1653_s10, 0 }
 0x2a8   : > { %2104 = sdivrem.u32 (!%p1656_p13), %s3038_s29, 20 }
 0x2a9   : > { %1260 = sbr.rel (%p1656_p13) target bundleno = 733 (0x2dd), region = 86 }
 0x2b1   : > { %s2883_s11 = spop.drf %2104 }
 0x2b2   : > { %p1657_p9 = scmp.le.s32.totalorder %s2883_s11, 0 }
 0x2b3   : > { %s3011_s23 = smov (!%p1657_p9), %s2877_s16  ;;  %s3012_s7 = smov (!%p1657_p9), %s2592_s30 }
 0x2b4   : > { %1544 = sbr.rel (%p1657_p9) target bundleno = 708 (0x2c4), region = 194  ;;  %s2892_s9 = smov (!%p1657_p9), 0  }
 0x2b5   : > { %s2894_s0 = smov (!%p1657_p9), 0  }
 0x2b9 LB: >> { %v1363_v2 = vld [vmem:[%s2282_s7] sm:$0xff]  ;;  %v1365_v4 = vld [vmem:[%s2282_s7 + $0x8] sm:$0xff]  ;;  %v1367_v6 = vld [vmem:[%s2282_s7 + $0x10] sm:$0xff]  ;;  %s1403_s25 = sadd.s32 1, %s2286_s9  ;;  %s1357_s0 = sadd.s32 1, %s2290_s0   ;;  %s2290_s0 = sphi %s2894_s0, %s1357_s0   ;;  %s2286_s9 = sphi %s2892_s9, %s3013_s9   ;;  %s2282_s7 = sphi %s3012_s7, %s1408_s7   ;;  %s2278_s23 = sphi %s3011_s23, %s1409_s23  }
 0x2ba   : >> { %1364 = vst [vmem:[%s2278_s23] sm:$0xff] %v1363_v2  ;;  %1366 = vst [vmem:[%s2278_s23 + $0x8] sm:$0xff] %v1365_v4  ;;  %v1369_v7 = vld [vmem:[%s2282_s7 + $0x18] sm:$0xff]  ;;  %v1371_v42 = vld [vmem:[%s2282_s7 + $0x20] sm:$0xff]  ;;  %p1404_p0 = scmp.ge.s32.totalorder %s1403_s25, %s2883_s11  ;;  %p1356_p1 = scmp.ge.s32.totalorder %s1357_s0, %s2883_s11 }
 0x2bb   : >> { %1368 = vst [vmem:[%s2278_s23 + $0x10] sm:$0xff] %v1367_v6  ;;  %v1373_v8 = vld [vmem:[%s2282_s7 + $0x28] sm:$0xff]  ;;  %1370 = vst [vmem:[%s2278_s23 + $0x18] sm:$0xff] %v1369_v7  ;;  %v1375_v9 = vld [vmem:[%s2282_s7 + $0x30] sm:$0xff] }
 0x2bc   : >> { %1372 = vst [vmem:[%s2278_s23 + $0x20] sm:$0xff] %v1371_v42  ;;  %1374 = vst [vmem:[%s2278_s23 + $0x28] sm:$0xff] %v1373_v8  ;;  %v1377_v10 = vld [vmem:[%s2282_s7 + $0x38] sm:$0xff]  ;;  %v1379_v20 = vld [vmem:[%s2282_s7 + $0x40] sm:$0xff]  ;;  %s3040_s25 = smov (%p1404_p0, %s1403_s25), 0 }
 0x2bd   : >> { %1376 = vst [vmem:[%s2278_s23 + $0x30] sm:$0xff] %v1375_v9  ;;  %1378 = vst [vmem:[%s2278_s23 + $0x38] sm:$0xff] %v1377_v10  ;;  %v1381_v11 = vld [vmem:[%s2282_s7 + $0x48] sm:$0xff]  ;;  %v1383_v5 = vld [vmem:[%s2282_s7 + $0x50] sm:$0xff]  ;;  %s1406_s6 = smul.u32 160, %s3040_s25  ;;  %s3013_s9 = smov %s3040_s25 }
 0x2be   : >> { %1380 = vst [vmem:[%s2278_s23 + $0x40] sm:$0xff] %v1379_v20  ;;  %v1385_v23 = vld [vmem:[%s2282_s7 + $0x58] sm:$0xff]  ;;  %1382 = vst [vmem:[%s2278_s23 + $0x48] sm:$0xff] %v1381_v11  ;;  %v1387_v51 = vld [vmem:[%s2282_s7 + $0x60] sm:$0xff] }
 0x2bf   : >> { %1384 = vst [vmem:[%s2278_s23 + $0x50] sm:$0xff] %v1383_v5  ;;  %1386 = vst [vmem:[%s2278_s23 + $0x58] sm:$0xff] %v1385_v23  ;;  %v1389_v13 = vld [vmem:[%s2282_s7 + $0x68] sm:$0xff]  ;;  %v1391_v19 = vld [vmem:[%s2282_s7 + $0x70] sm:$0xff]  ;;  %1359 = sbr.rel (!%p1356_p1) target bundleno = 697 (0x2b9), region = 200 }
 0x2c0   : >> { %1388 = vst [vmem:[%s2278_s23 + $0x60] sm:$0xff] %v1387_v51  ;;  %1390 = vst [vmem:[%s2278_s23 + $0x68] sm:$0xff] %v1389_v13  ;;  %v1393_v14 = vld [vmem:[%s2282_s7 + $0x78] sm:$0xff]  ;;  %v1395_v56 = vld [vmem:[%s2282_s7 + $0x80] sm:$0xff] }
 0x2c1   : >> { %1392 = vst [vmem:[%s2278_s23 + $0x70] sm:$0xff] %v1391_v19  ;;  %v1397_v3 = vld [vmem:[%s2282_s7 + $0x88] sm:$0xff]  ;;  %1394 = vst [vmem:[%s2278_s23 + $0x78] sm:$0xff] %v1393_v14  ;;  %v1399_v37 = vld [vmem:[%s2282_s7 + $0x90] sm:$0xff] }
 0x2c2   : >> { %1396 = vst [vmem:[%s2278_s23 + $0x80] sm:$0xff] %v1395_v56  ;;  %1398 = vst [vmem:[%s2278_s23 + $0x88] sm:$0xff] %v1397_v3  ;;  %v1401_v15 = vld [vmem:[%s2282_s7 + $0x98] sm:$0xff]  ;;  %s1408_s7 = scalar_lea.vmem %s2592_s30, %s1406_s6 [#allocation4]  }
 0x2c3   : >> { %1400 = vst [vmem:[%s2278_s23 + $0x90] sm:$0xff] %v1399_v37  ;;  %1402 = vst [vmem:[%s2278_s23 + $0x98] sm:$0xff] %v1401_v15  ;;  %s1409_s23 = scalar_lea.vmem %s2877_s16, %s1406_s6  }
 0x2c4 PF: > { %2106 = sdivrem.u32 %s3038_s29, 20 }
 0x2c5   : > { %s1658_s15 = smul.u32 160, %s2883_s11 }
 0x2c7   : > { %s1414_s17 = scalar_lea.vmem %s2592_s30, %s1658_s15 [#allocation4]   ;;  %s1416_s18 = scalar_lea.vmem %s2877_s16, %s1658_s15  }
 0x2cd   : > { %s2107_s20 = spop.drf %2106 }
 0x2ce   : > { %p1660_p2 = scmp.le.s32.totalorder %s2107_s20, 0 }
 0x2cf   : > { %s2292_s8 = smov (!%p1660_p2), %s1416_s18   ;;  %s2296_s27 = smov (!%p1660_p2), %s1414_s17  }
 0x2d0   : > { %1558 = sbr.rel (%p1660_p2) target bundleno = 733 (0x2dd), region = 205  ;;  %s2300_s28 = smov (!%p1660_p2), 0  }
 0x2d1   : > { %s2304_s22 = smov (!%p1660_p2), 0  }
 0x2d5 LB: >> { %v1426_v59 = vld [vmem:[%s2298_s27] sm:$0xff]  ;;  %s1428_s14 = sadd.s32 1, %s2302_s28  ;;  %s1420_s22 = sadd.s32 1, %s2306_s22   ;;  %s2306_s22 = sphi %s2304_s22, %s1420_s22   ;;  %s2302_s28 = sphi %s2300_s28, %s2301_s28   ;;  %s2298_s27 = sphi %s2296_s27, %s1433_s27   ;;  %s2294_s8 = sphi %s2292_s8, %s1434_s8  }
 0x2d6   : >> { %1427 = vst [vmem:[%s2294_s8] sm:$0xff] %v1426_v59  ;;  %p1429_p3 = scmp.ge.s32.totalorder %s1428_s14, %s2107_s20  ;;  %p1419_p4 = scmp.ge.s32.totalorder %s1420_s22, %s2107_s20 }
 0x2d8   : >> { %s3042_s14 = smov (%p1429_p3, %s1428_s14), 0  ;;  %1422 = sbr.rel (!%p1419_p4) target bundleno = 725 (0x2d5), region = 211 }
 0x2d9   : >> { %s1661_s30 = sshll.u32 %s3042_s14, 3  ;;  %s2301_s28 = smov %s3042_s14  }
 0x2da   : >> { %s1433_s27 = scalar_lea.vmem %s1414_s17, %s1661_s30 [#allocation4]   ;;  %s1434_s8 = scalar_lea.vmem %s1416_s18, %s1661_s30  }
 0x2dd PF: > { %s15_s26 = sadd.s32 1, %s2242_s26   ;;  %s3014_s23 = sld [smem:[#allocation5_spill]] }
 0x2de   : > { %p12_p5 = scmp.ge.s32.totalorder %s15_s26, 6   ;;  %s3015_s29 = sld [smem:[#allocation6_spill]] }
 0x2df   : > { %s3016_s25 = sld [smem:[#allocation7_spill]]  ;;  %s3017_s18 = smov %s2214_s19 }
 0x2e0   : > { %s3018_s19 = smov %s2412_s12  ;;  %s3019_s20 = smov %s2222_s21 }
 0x2e1   : > { %s3020_s21 = smov %s2415_s13  ;;  %s3021_s22 = smov %s2234_s24 }
 0x2e2   :  { %14 = sbr.rel (!%p12_p5) target bundleno = 7 (0x7), region = 222 }
 0x2e4   : > { %s3022_s24 = smov %s3015_s29 }

// kernel: wan_time_text_image_embedding.3
= control target key start
LH: loop header
LB: loop body
LE: loop exit
PB: predicated region body
PF: predicated region fallthrough
CT: control target
= control target key end

     0   :  { %s1729_s30 = smov 0   ;;  %s2326_s0 = inlined_call_operand.vmem [shape: f32[154,256], index: 0, kind: input, shape index: {}]   ;;  %s2327_s1 = inlined_call_operand.vmem [shape: f32[1,256], index: 1, kind: input, shape index: {}]   ;;  %s2328_s2 = inlined_call_operand.vmem [shape: f32[1,256], index: 2, kind: input, shape index: {}]   ;;  %s2329_s3 = inlined_call_operand.vmem [shape: bf16[256,256], index: 3, kind: input, shape index: {}]   ;;  %s2330_s4 = inlined_call_operand.vmem [shape: f32[1,256], index: 4, kind: input, shape index: {}]   ;;  %s2331_s5 = inlined_call_operand.vmem [shape: bf16[256,128], index: 5, kind: input, shape index: {}]   ;;  %s2332_s6 = inlined_call_operand.vmem [shape: f32[1,128], index: 6, kind: input, shape index: {}]   ;;  %s2333_s7 = inlined_call_operand.vmem [shape: f32[1,128], index: 7, kind: input, shape index: {}]   ;;  %s2334_s8 = inlined_call_operand.vmem [shape: f32[1,128], index: 8, kind: input, shape index: {}]   ;;  %s2335_s9 = inlined_call_operand.vmem [shape: f32[154,128], index: 9, kind: output, shape index: {}]  }
   0x1 LB: > { %s1411_s10 = sadd.s32 4294967295, %s1677_s30   ;;  %p1415_p0 = scmp.ge.s32.totalorder %s1677_s30, 1  ;;  %s1677_s30 = sphi %s1729_s30, %s19_s30  }
   0x2   : > { %p289_p1 = scmp.lt.s32.totalorder %s1677_s30, 3 }
   0x4   : > { %p290_p2 = pnand %p1415_p0, %p289_p1 }
   0x5   : > { %s326_s11 = smul.u32 (!%p290_p2), 10, %s1411_s10 }
   0x6   : > { %293 = sbr.rel (%p290_p2) target bundleno = 1098 (0x44a), region = 56 }
   0x7   : > { %p327_p3 = scmp.lt.s32.totalorder (!%p290_p2), %s326_s11, 19 }
   0xb   : > { %s2337_s11 = smov (!%p327_p3, %s326_s11), 19  ;;  %v1527_v30 = vld [vmem:[%s2329_s3 + $0x74] ss:$8 sps:$4 sm:$0xff]   ;;  %v1529_v31 = vld [vmem:[%s2329_s3 + $0x70] ss:$8 sps:$4 sm:$0xff]  }
   0xc   : > { %s1472_s12 = sshll.u32 %s2337_s11, 4  ;;  %v1530_v32 = vld [vmem:[%s2329_s3 + $0x64] ss:$8 sps:$4 sm:$0xff]   ;;  %799 = vmatprep.subr.bf16.mxu0 %v1527_v30  ;;  %v1532_v33 = vld [vmem:[%s2329_s3 + $0x60] ss:$8 sps:$4 sm:$0xff]   ;;  %s1418_s27 = sshll.u32 %s2337_s11, 3 }
   0xd   : > { %s1743_s15 = scalar_lea.vmem %s2326_s0, %s1472_s12  ;;  %800 = vmatpush1.bf16.msra.mxu0 %v1529_v31  ;;  %v1533_v34 = vld [vmem:[%s2329_s3 + $0x54] ss:$8 sps:$4 sm:$0xff]   ;;  %v1535_v35 = vld [vmem:[%s2329_s3 + $0x50] ss:$8 sps:$4 sm:$0xff]   ;;  %v1536_v36 = vld [vmem:[%s2329_s3 + $0x44] ss:$8 sps:$4 sm:$0xff]   ;;  %s2283_s13 = scalar_lea.vmem %s2335_s9, %s1418_s27 }
   0xe   : > { %v1746_v0 = vld [vmem:[%s1743_s15] sm:$0xff]  ;;  %v1749_v1 = vld [vmem:[%s1743_s15 + $0x8] sm:$0xff]  ;;  %v1760_v5 = vld [vmem:[%s1743_s15 + $0x10] sm:$0xff]  ;;  %801 = vmatprep.subr.bf16.mxu0 %v1530_v32 }
   0xf   : > { %v1752_v2 = vld [vmem:[%s1743_s15 + $0x20] sm:$0xff]  ;;  %v362_v3 = vadd.f32 %v1749_v1, %v1746_v0  ;;  %v1757_v4 = vld [vmem:[%s1743_s15 + $0x28] sm:$0xff]  ;;  %v1763_v6 = vld [vmem:[%s1743_s15 + $0x18] sm:$0xff] }
  0x10   : > { %v368_v7 = vadd.f32 %v1757_v4, %v1752_v2  ;;  %v1768_v8 = vld [vmem:[%s1743_s15 + $0x30] sm:$0xff]  ;;  %v1771_v9 = vld [vmem:[%s1743_s15 + $0x38] sm:$0xff]  ;;  %v365_v10 = vadd.f32 %v1763_v6, %v1760_v5  ;;  %v1778_v12 = vld [vmem:[%s1743_s15 + $0x40] sm:$0xff] }
  0x11   : > { %363 = vadd.xlane.f32.xlu0 %v362_v3  ;;  %v371_v11 = vadd.f32 %v1771_v9, %v1768_v8  ;;  %v1781_v13 = vld [vmem:[%s1743_s15 + $0x48] sm:$0xff]  ;;  %v1784_v14 = vld [vmem:[%s1743_s15 + $0x50] sm:$0xff]  ;;  %v1787_v15 = vld [vmem:[%s1743_s15 + $0x58] sm:$0xff]  ;;  %802 = vmatpush1.bf16.msra.mxu0 %v1532_v33 }
  0x12   : > { %369 = vadd.xlane.f32.xlu1 %v368_v7  ;;  %v1790_v16 = vld [vmem:[%s1743_s15 + $0x60] sm:$0xff]  ;;  %v1793_v17 = vld [vmem:[%s1743_s15 + $0x68] sm:$0xff]  ;;  %v374_v18 = vadd.f32 %v1781_v13, %v1778_v12  ;;  %v1798_v19 = vld [vmem:[%s1743_s15 + $0x70] sm:$0xff]  ;;  %v377_v21 = vadd.f32 %v1787_v15, %v1784_v14  ;;  %803 = vmatprep.subr.bf16.mxu0 %v1533_v34 }
  0x13   : > { %v1801_v20 = vld [vmem:[%s1743_s15 + $0x78] sm:$0xff]  ;;  %v1806_v22 = vld [vmem:[%s1743_s15 + $0x80] sm:$0xff]  ;;  %v1809_v23 = vld [vmem:[%s1743_s15 + $0x88] sm:$0xff]  ;;  %v380_v24 = vadd.f32 %v1793_v17, %v1790_v16 }
  0x14   : > { %v1814_v25 = vld [vmem:[%s1743_s15 + $0x90] sm:$0xff]  ;;  %v1817_v26 = vld [vmem:[%s1743_s15 + $0x98] sm:$0xff]  ;;  %v383_v27 = vadd.f32 %v1801_v20, %v1798_v19  ;;  %v386_v28 = vadd.f32 %v1809_v23, %v1806_v22  ;;  %v1538_v37 = vld [vmem:[%s2329_s3 + $0x40] ss:$8 sps:$4 sm:$0xff]  }
  0x15   : > { %366 = vadd.xlane.f32.xlu0 %v365_v10  ;;  %v389_v29 = vadd.f32 %v1817_v26, %v1814_v25  ;;  %804 = vmatpush1.bf16.msra.mxu0 %v1535_v35  ;;  %v1539_v38 = vld [vmem:[%s2329_s3 + $0x34] ss:$8 sps:$4 sm:$0xff]   ;;  %v1541_v39 = vld [vmem:[%s2329_s3 + $0x30] ss:$8 sps:$4 sm:$0xff]   ;;  %v1542_v40 = vld [vmem:[%s2329_s3 + $0x24] ss:$8 sps:$4 sm:$0xff]  }
  0x16   : > { %372 = vadd.xlane.f32.xlu1 %v371_v11  ;;  %805 = vmatprep.subr.bf16.mxu0 %v1536_v36  ;;  %v1544_v41 = vld [vmem:[%s2329_s3 + $0x20] ss:$8 sps:$4 sm:$0xff]   ;;  %v1545_v42 = vld [vmem:[%s2329_s3 + $0x14] ss:$8 sps:$4 sm:$0xff]   ;;  %v1547_v43 = vld [vmem:[%s2329_s3 + $0x10] ss:$8 sps:$4 sm:$0xff]  }
  0x17   : > { %v1548_v44 = vld [vmem:[%s2329_s3 + $0x4] ss:$8 sps:$4 sm:$0xff]   ;;  %v1550_v45 = vld [vmem:[%s2329_s3] ss:$8 sps:$4 sm:$0xff]   ;;  %v1551_v46 = vld [vmem:[%s2329_s3 + $0xf4] ss:$8 sps:$4 sm:$0xff]  }
  0x19   : > { %375 = vadd.xlane.f32.xlu0 %v374_v18  ;;  %806 = vmatpush1.bf16.msra.mxu0 %v1538_v37 }
  0x1a   : > { %378 = vadd.xlane.f32.xlu1 %v377_v21  ;;  %807 = vmatprep.subr.bf16.mxu0 %v1539_v38 }
  0x1d   : > { %381 = vadd.xlane.f32.xlu0 %v380_v24  ;;  %808 = vmatpush1.bf16.msra.mxu0 %v1541_v39 }
  0x1e   : > { %384 = vadd.xlane.f32.xlu1 %v383_v27  ;;  %809 = vmatprep.subr.bf16.mxu0 %v1542_v40 }
  0x21   : > { %387 = vadd.xlane.f32.xlu0 %v386_v28  ;;  %810 = vmatpush1.bf16.msra.mxu0 %v1544_v41 }
  0x22   : > { %390 = vadd.xlane.f32.xlu1 %v389_v29  ;;  %811 = vmatprep.subr.bf16.mxu0 %v1545_v42 }
  0x25   : > { %812 = vmatpush1.bf16.msra.mxu0 %v1547_v43 }
  0x26   : > { %813 = vmatprep.subr.bf16.mxu0 %v1548_v44 }
  0x29   : > { %814 = vmatpush1.bf16.msra.mxu0 %v1550_v45 }
  0x2a   : > { %815 = vmatprep.subr.bf16.mxu0 %v1551_v46 }
  0x9a   : > { %v364_v47 = vpop.xlane.xlu0 %363 }
  0x9b   : > { %v393_v48 = vmul.f32 0.00390625, %v364_v47  ;;  %v370_v49 = vpop.xlane.xlu1 %369 }
  0x9c   : > { %v395_v50 = vmul.f32 0.00390625, %v370_v49 }
  0x9d   : > { %v1877_v51 = vsub.f32 %v1746_v0, %v393_v48  ;;  %v1880_v52 = vsub.f32 %v1749_v1, %v393_v48 }
  0x9e   : > { %v1883_v53 = vsub.f32 %v1752_v2, %v395_v50  ;;  %v1886_v54 = vsub.f32 %v1757_v4, %v395_v50  ;;  %v367_v55 = vpop.xlane.xlu0 %366 }
  0x9f   : > { %v394_v56 = vmul.f32 0.00390625, %v367_v55  ;;  %v373_v57 = vpop.xlane.xlu1 %372  ;;  %v423_v58 = vmul.f32 %v1877_v51, %v1877_v51  ;;  %v424_v59 = vmul.f32 %v1880_v52, %v1880_v52  ;;  %v1554_v55 = vld [vmem:[%s2329_s3 + $0xe4] ss:$8 sps:$4 sm:$0xff]  }
  0xa0   : > { %v396_v60 = vmul.f32 0.00390625, %v373_v57  ;;  %v427_v61 = vmul.f32 %v1883_v53, %v1883_v53  ;;  %v428_v62 = vmul.f32 %v1886_v54, %v1886_v54  ;;  %v1556_v57 = vld [vmem:[%s2329_s3 + $0xe0] ss:$8 sps:$4 sm:$0xff]  }
  0xa1   : > { %v1897_v63 = vsub.f32 %v1760_v5, %v394_v56  ;;  %v1900_v0 = vsub.f32 %v1763_v6, %v394_v56  ;;  %v443_v1 = vadd.f32 %v424_v59, %v423_v58 }
  0xa2   : > { %v1903_v2 = vsub.f32 %v1768_v8, %v396_v60  ;;  %v1906_v3 = vsub.f32 %v1771_v9, %v396_v60  ;;  %v376_v4 = vpop.xlane.xlu0 %375  ;;  %v449_v11 = vadd.f32 %v428_v62, %v427_v61  ;;  %v1557_v60 = vld [vmem:[%s2329_s3 + $0xd4] ss:$8 sps:$4 sm:$0xff]   ;;  %v1559_v61 = vld [vmem:[%s2329_s3 + $0xd0] ss:$8 sps:$4 sm:$0xff]   ;;  %v1560_v62 = vld [vmem:[%s2329_s3 + $0xc4] ss:$8 sps:$4 sm:$0xff]  }
  0xa3   : > { %v397_v7 = vmul.f32 0.00390625, %v376_v4  ;;  %444 = vadd.xlane.f32.xlu0 %v443_v1  ;;  %v379_v10 = vpop.xlane.xlu1 %378  ;;  %v425_v18 = vmul.f32 %v1897_v63, %v1897_v63  ;;  %v426_v5 = vmul.f32 %v1900_v0, %v1900_v0  ;;  %v1562_v1 = vld [vmem:[%s2329_s3 + $0xc0] ss:$8 sps:$4 sm:$0xff]   ;;  %v1563_v4 = vld [vmem:[%s2329_s3 + $0xb4] ss:$8 sps:$4 sm:$0xff]  }
  0xa4   : > { %v398_v6 = vmul.f32 0.00390625, %v379_v10  ;;  %v429_v21 = vmul.f32 %v1903_v2, %v1903_v2  ;;  %v430_v8 = vmul.f32 %v1906_v3, %v1906_v3  ;;  %v1566_v10 = vld [vmem:[%s2329_s3 + $0xa4] ss:$8 sps:$4 sm:$0xff]  }
  0xa5   : > { %v1917_v9 = vsub.f32 %v1778_v12, %v397_v7  ;;  %v1920_v24 = vsub.f32 %v1781_v13, %v397_v7  ;;  %v446_v27 = vadd.f32 %v426_v5, %v425_v18  ;;  %v1565_v7 = vld [vmem:[%s2329_s3 + $0xb0] ss:$8 sps:$4 sm:$0xff]   ;;  %v1569_v18 = vld [vmem:[%s2329_s3 + $0x94] ss:$8 sps:$4 sm:$0xff]  }
  0xa6   : > { %v1923_v28 = vsub.f32 %v1784_v14, %v398_v6  ;;  %v1926_v29 = vsub.f32 %v1787_v15, %v398_v6  ;;  %v382_v30 = vpop.xlane.xlu0 %381  ;;  %v452_v33 = vadd.f32 %v430_v8, %v429_v21  ;;  %v1571_v5 = vld [vmem:[%s2329_s3 + $0x90] ss:$8 sps:$4 sm:$0xff]   ;;  %v1572_v6 = vld [vmem:[%s2329_s3 + $0x84] ss:$8 sps:$4 sm:$0xff]   ;;  %v1574_v21 = vld [vmem:[%s2329_s3 + $0x80] ss:$8 sps:$4 sm:$0xff]  }
  0xa7   : > { %v399_v31 = vmul.f32 0.00390625, %v382_v30  ;;  %450 = vadd.xlane.f32.xlu0 %v449_v11  ;;  %447 = vadd.xlane.f32.xlu1 %v446_v27  ;;  %v385_v32 = vpop.xlane.xlu1 %384  ;;  %v431_v12 = vmul.f32 %v1917_v9, %v1917_v9  ;;  %v432_v13 = vmul.f32 %v1920_v24, %v1920_v24  ;;  %v1568_v11 = vld [vmem:[%s2329_s3 + $0xa0] ss:$8 sps:$4 sm:$0xff]  }
  0xa8   : > { %v400_v34 = vmul.f32 0.00390625, %v385_v32  ;;  %v433_v14 = vmul.f32 %v1923_v28, %v1923_v28  ;;  %v434_v15 = vmul.f32 %v1926_v29, %v1926_v29 }
  0xa9   : > { %v1937_v35 = vsub.f32 %v1790_v16, %v399_v31  ;;  %v1940_v36 = vsub.f32 %v1793_v17, %v399_v31  ;;  %v455_v37 = vadd.f32 %v432_v13, %v431_v12  ;;  %v524_v13 = vlaneseq }
  0xaa   : > { %v1943_v38 = vsub.f32 %v1798_v19, %v400_v34  ;;  %v1946_v39 = vsub.f32 %v1801_v20, %v400_v34  ;;  %v388_v40 = vpop.xlane.xlu0 %387  ;;  %v458_v43 = vadd.f32 %v434_v15, %v433_v14  ;;  %v1553_v19 = vld [vmem:[%s2329_s3 + $0xf0] ss:$8 sps:$4 sm:$0xff]  }
  0xab   : > { %v401_v41 = vmul.f32 0.00390625, %v388_v40  ;;  %453 = vadd.xlane.f32.xlu1 %v452_v33  ;;  %456 = vadd.xlane.f32.xlu0 %v455_v37  ;;  %v391_v42 = vpop.xlane.xlu1 %390  ;;  %v435_v16 = vmul.f32 %v1937_v35, %v1937_v35  ;;  %v436_v17 = vmul.f32 %v1940_v36, %v1940_v36 }
  0xac   : > { %v402_v44 = vmul.f32 0.00390625, %v391_v42  ;;  %v437_v20 = vmul.f32 %v1943_v38, %v1943_v38  ;;  %v438_v45 = vmul.f32 %v1946_v39, %v1946_v39  ;;  %816 = vmatpush2.bf16.msra.mxu0 %v1553_v19  ;;  %v525_v42 = vshrl.u32 %v524_v13, 7 }
  0xad   : > { %v1960_v46 = vsub.f32 %v1806_v22, %v401_v41  ;;  %v1963_v47 = vsub.f32 %v1809_v23, %v401_v41  ;;  %v461_v48 = vadd.f32 %v436_v17, %v435_v16  ;;  %817 = vmatprep.subr.bf16.mxu0 %v1554_v55 }
  0xae   : > { %v1966_v49 = vsub.f32 %v1814_v25, %v402_v44  ;;  %v1969_v50 = vsub.f32 %v1817_v26, %v402_v44  ;;  %v464_v56 = vadd.f32 %v438_v45, %v437_v20  ;;  %v2021_v45 = vsub.s32 0, %v525_v42 }
  0xaf   : > { %459 = vadd.xlane.f32.xlu1 %v458_v43  ;;  %462 = vadd.xlane.f32.xlu0 %v461_v48  ;;  %v439_v22 = vmul.f32 %v1960_v46, %v1960_v46  ;;  %v440_v23 = vmul.f32 %v1963_v47, %v1963_v47  ;;  %v2023_v48 = vsub.s32 1, %v525_v42 }
  0xb0   : > { %v441_v25 = vmul.f32 %v1966_v49, %v1966_v49  ;;  %v442_v26 = vmul.f32 %v1969_v50, %v1969_v50  ;;  %818 = vmatpush2.bf16.msra.mxu0 %v1556_v57 }
  0xb1   : > { %v467_v58 = vadd.f32 %v440_v23, %v439_v22  ;;  %819 = vmatprep.subr.bf16.mxu0 %v1557_v60 }
  0xb2   : > { %v470_v59 = vadd.f32 %v442_v26, %v441_v25 }
  0xb3   : > { %465 = vadd.xlane.f32.xlu1 %v464_v56  ;;  %468 = vadd.xlane.f32.xlu0 %v467_v58  ;;  %v360_v56 = vld [vmem:[%s2327_s1] sm:$0x3] }
  0xb4   : > { %820 = vmatpush2.bf16.msra.mxu0 %v1559_v61  ;;  %v2029_v58 = vrot.slane %v360_v56, %v2021_v45  ;;  %v361_v61 = vld [vmem:[%s2328_s2] sm:$0x3] }
  0xb5   : > { %821 = vmatprep.subr.bf16.mxu0 %v1560_v62 }
  0xb7   : > { %471 = vadd.xlane.f32.xlu1 %v470_v59  ;;  %v2032_v59 = vrot.slane %v360_v56, %v2023_v48 }
  0xb8   : > { %822 = vmatpush2.bf16.msra.mxu0 %v1562_v1 }
  0xb9   : > { %823 = vmatprep.subr.bf16.mxu0 %v1563_v4 }
  0xbc   : > { %824 = vmatpush2.bf16.msra.mxu0 %v1565_v7 }
  0xbd   : > { %825 = vmatprep.subr.bf16.mxu0 %v1566_v10 }
  0xc0   : > { %826 = vmatpush2.bf16.msra.mxu0 %v1568_v11 }
  0xc1   : > { %827 = vmatprep.subr.bf16.mxu0 %v1569_v18 }
  0xc4   : > { %828 = vmatpush2.bf16.msra.mxu0 %v1571_v5  ;;  %v2041_v5 = vrot.slane %v361_v61, %v2021_v45 }
  0xc5   : > { %829 = vmatprep.subr.bf16.mxu0 %v1572_v6  ;;  %v2044_v6 = vrot.slane %v361_v61, %v2023_v48 }
  0xc8   : > { %830 = vmatpush2.bf16.msra.mxu0 %v1574_v21 }
 0x12c   : > { %v445_v8 = vpop.xlane.xlu0 %444 }
 0x12d   : > { %v473_v27 = vmul.f32 0.00390625, %v445_v8 }
 0x12f   : > { %v483_v30 = vadd.f32 1e-05, %v473_v27 }
 0x130   : > { %v448_v31 = vpop.xlane.xlu1 %447  ;;  %v451_v32 = vpop.xlane.xlu0 %450 }
 0x131   : > { %1591 = vrsqrt.f32 %v483_v30  ;;  %v474_v33 = vmul.f32 0.00390625, %v448_v31  ;;  %v475_v12 = vmul.f32 0.00390625, %v451_v32 }
 0x133   : > { %v484_v34 = vadd.f32 1e-05, %v474_v33  ;;  %v485_v14 = vadd.f32 1e-05, %v475_v12 }
 0x134   : > { %v454_v15 = vpop.xlane.xlu1 %453  ;;  %v457_v37 = vpop.xlane.xlu0 %456 }
 0x135   : > { %1593 = vrsqrt.f32 %v484_v34  ;;  %v476_v40 = vmul.f32 0.00390625, %v454_v15  ;;  %v477_v41 = vmul.f32 0.00390625, %v457_v37 }
 0x136   : > { %1595 = vrsqrt.f32 %v485_v14 }
 0x137   : > { %v486_v43 = vadd.f32 1e-05, %v476_v40  ;;  %v487_v16 = vadd.f32 1e-05, %v477_v41 }
 0x138   : > { %v460_v17 = vpop.xlane.xlu1 %459  ;;  %v463_v19 = vpop.xlane.xlu0 %462 }
 0x139   : > { %1597 = vrsqrt.f32 %v486_v43  ;;  %v478_v44 = vmul.f32 0.00390625, %v460_v17  ;;  %v479_v20 = vmul.f32 0.00390625, %v463_v19 }
 0x13a   : > { %1599 = vrsqrt.f32 %v487_v16 }
 0x13b   : > { %v488_v55 = vadd.f32 1e-05, %v478_v44  ;;  %v489_v22 = vadd.f32 1e-05, %v479_v20 }
 0x13c   : > { %v466_v23 = vpop.xlane.xlu1 %465  ;;  %v469_v26 = vpop.xlane.xlu0 %468 }
 0x13d   : > { %1601 = vrsqrt.f32 %v488_v55  ;;  %v480_v25 = vmul.f32 0.00390625, %v466_v23  ;;  %v481_v4 = vmul.f32 0.00390625, %v469_v26 }
 0x13e   : > { %v1592_v57 = vpop.eup %1591  ;;  %1603 = vrsqrt.f32 %v489_v22 }
 0x13f   : > { %v490_v60 = vadd.f32 1e-05, %v480_v25  ;;  %v504_v62 = vmul.f32 %v1592_v57, %v1880_v52  ;;  %v503_v1 = vmul.f32 %v1592_v57, %v1877_v51  ;;  %v491_v30 = vadd.f32 1e-05, %v481_v4 }
 0x140   : > { %v472_v7 = vpop.xlane.xlu1 %471 }
 0x141   : > { %1605 = vrsqrt.f32 %v490_v60  ;;  %v482_v10 = vmul.f32 0.00390625, %v472_v7  ;;  %v535_v18 = vmul.f32 %v2032_v59, %v504_v62  ;;  %v534_v21 = vmul.f32 %v2029_v58, %v503_v1 }
 0x142   : > { %v1594_v11 = vpop.eup %1593 }
 0x143   : > { %v1596_v8 = vpop.eup %1595  ;;  %v492_v52 = vadd.f32 1e-05, %v482_v10  ;;  %v506_v51 = vmul.f32 %v1594_v11, %v1900_v0  ;;  %v505_v27 = vmul.f32 %v1594_v11, %v1897_v63  ;;  %v566_v13 = vadd.f32 %v2044_v6, %v535_v18 }
 0x144   : > { %v508_v31 = vmul.f32 %v1596_v8, %v1886_v54  ;;  %v565_v34 = vadd.f32 %v2041_v5, %v534_v21  ;;  %v507_v40 = vmul.f32 %v1596_v8, %v1883_v53 }
 0x145   : > { %v537_v32 = vmul.f32 %v2032_v59, %v506_v51  ;;  %v536_v33 = vmul.f32 %v2029_v58, %v505_v27  ;;  %1607 = vrsqrt.f32 %v492_v52 }
 0x146   : > { %v1598_v12 = vpop.eup %1597  ;;  %v539_v14 = vmul.f32 %v2032_v59, %v508_v31  ;;  %1609 = vrsqrt.f32 %v491_v30 }
 0x147   : > { %v1600_v15 = vpop.eup %1599  ;;  %v568_v0 = vadd.f32 %v2044_v6, %v537_v32  ;;  %v567_v63 = vadd.f32 %v2041_v5, %v536_v33  ;;  %v510_v37 = vmul.f32 %v1598_v12, %v1906_v3  ;;  %v509_v54 = vmul.f32 %v1598_v12, %v1903_v2 }
 0x148   : > { %v512_v16 = vmul.f32 %v1600_v15, %v1920_v24  ;;  %v570_v44 = vadd.f32 %v2044_v6, %v539_v14  ;;  %v538_v2 = vmul.f32 %v2029_v58, %v507_v40  ;;  %v511_v60 = vmul.f32 %v1600_v15, %v1917_v9 }
 0x149   : > { %v586_v41 = vpack.c.bf16 %v568_v0, %v566_v13  ;;  %v585_v42 = vpack.c.bf16 %v567_v63, %v565_v34  ;;  %v541_v43 = vmul.f32 %v2032_v59, %v510_v37  ;;  %v540_v19 = vmul.f32 %v2029_v58, %v509_v54 }
 0x14a   : > { %v1602_v17 = vpop.eup %1601  ;;  %v543_v56 = vmul.f32 %v2032_v59, %v512_v16  ;;  %v542_v11 = vmul.f32 %v2029_v58, %v511_v60  ;;  %v1582_v16 = vld [vmem:[%s2331_s5 + $0x20] sm:$0xff]  }
 0x14b   : > { %831 = vmatprep.mubr.bf16.mxu0 %v586_v41  ;;  %v572_v20 = vadd.f32 %v2044_v6, %v541_v43  ;;  %v514_v3 = vmul.f32 %v1602_v17, %v1926_v29  ;;  %v1604_v53 = vpop.eup %1603  ;;  %v571_v23 = vadd.f32 %v2041_v5, %v540_v19  ;;  %v513_v25 = vmul.f32 %v1602_v17, %v1923_v28  ;;  %v1579_v41 = vld [vmem:[%s2331_s5 + $0x68] sm:$0xff]   ;;  %v1581_v43 = vld [vmem:[%s2331_s5 + $0x60] sm:$0xff]   ;;  %v1583_v17 = vld [vmem:[%s2331_s5 + $0x58] sm:$0xff]  }
 0x14c   : > { %832 = vmatmul.mubr.bf16.vlgmr.msra.gmra.mxu0 %v585_v42  ;;  %v569_v29 = vadd.f32 %v2041_v5, %v538_v2  ;;  %v574_v61 = vadd.f32 %v2044_v6, %v543_v56  ;;  %v516_v62 = vmul.f32 %v1604_v53, %v1940_v36  ;;  %v573_v52 = vadd.f32 %v2041_v5, %v542_v11  ;;  %v1580_v42 = vld [vmem:[%s2331_s5 + $0x28] sm:$0xff]   ;;  %v1584_v19 = vld [vmem:[%s2331_s5 + $0x18] sm:$0xff]   ;;  %v627_v56 = vld [vmem:[%s2330_s4] sm:$0x3] }
 0x14d   : > { %v588_v55 = vpack.c.bf16 %v572_v20, %v570_v44  ;;  %v545_v22 = vmul.f32 %v2032_v59, %v514_v3  ;;  %v544_v4 = vmul.f32 %v2029_v58, %v513_v25  ;;  %v515_v51 = vmul.f32 %v1604_v53, %v1937_v35  ;;  %v1585_v44 = vld [vmem:[%s2331_s5 + $0x50] sm:$0xff]   ;;  %v1587_v3 = vld [vmem:[%s2331_s5 + $0x48] sm:$0xff]   ;;  %v1589_v53 = vld [vmem:[%s2331_s5 + $0x40] sm:$0xff]  }
 0x14e   : > { %v1606_v24 = vpop.eup %1605  ;;  %v587_v1 = vpack.c.bf16 %v571_v23, %v569_v29  ;;  %v1586_v20 = vld [vmem:[%s2331_s5 + $0x10] sm:$0xff]   ;;  %v1588_v2 = vld [vmem:[%s2331_s5 + $0x8] sm:$0xff]  }
 0x14f   : > { %841 = vmatprep.mubr.bf16.mxu0 %v588_v55  ;;  %v576_v26 = vadd.f32 %v2044_v6, %v545_v22  ;;  %v518_v57 = vmul.f32 %v1606_v24, %v1946_v39  ;;  %v547_v39 = vmul.f32 %v2032_v59, %v516_v62  ;;  %v575_v9 = vadd.f32 %v2041_v5, %v544_v4  ;;  %v1590_v55 = vld [vmem:[%s2331_s5] sm:$0xff]  }
 0x150   : > { %v517_v21 = vmul.f32 %v1606_v24, %v1943_v38  ;;  %v546_v38 = vmul.f32 %v2029_v58, %v515_v51  ;;  %v2155_v22 = vrot.slane %v627_v56, %v2021_v45  ;;  %v2158_v24 = vrot.slane %v627_v56, %v2023_v48 }
 0x151   : > { %v590_v10 = vpack.c.bf16 %v576_v26, %v574_v61  ;;  %v549_v28 = vmul.f32 %v2032_v59, %v518_v57  ;;  %v578_v27 = vadd.f32 %v2044_v6, %v547_v39  ;;  %v589_v31 = vpack.c.bf16 %v575_v9, %v573_v52 }
 0x152   : > { %v1608_v7 = vpop.eup %1607  ;;  %v548_v32 = vmul.f32 %v2029_v58, %v517_v21 }
 0x153   : > { %v1610_v18 = vpop.eup %1609  ;;  %v580_v36 = vadd.f32 %v2044_v6, %v549_v28  ;;  %v522_v8 = vmul.f32 %v1608_v7, %v1969_v50  ;;  %v521_v35 = vmul.f32 %v1608_v7, %v1966_v49 }
 0x154   : > { %842 = vmatmul.mubr.bf16.gmra.mxu0 %v587_v1  ;;  %v520_v30 = vmul.f32 %v1610_v18, %v1963_v47  ;;  %v579_v13 = vadd.f32 %v2041_v5, %v548_v32  ;;  %v577_v47 = vadd.f32 %v2041_v5, %v546_v38  ;;  %v519_v14 = vmul.f32 %v1610_v18, %v1960_v46  ;;  %v1575_v46 = vld [vmem:[%s2331_s5 + $0x78] sm:$0xff]  }
 0x155   : > { %851 = vmatprep.mubr.bf16.mxu0 %v590_v10  ;;  %v592_v33 = vpack.c.bf16 %v580_v36, %v578_v27  ;;  %v553_v12 = vmul.f32 %v2032_v59, %v522_v8  ;;  %v552_v63 = vmul.f32 %v2029_v58, %v521_v35  ;;  %1473 = vmatprep.subr.bf16.mxu1 %v1575_v46 }
 0x156   : > { %v551_v50 = vmul.f32 %v2032_v59, %v520_v30  ;;  %v591_v0 = vpack.c.bf16 %v579_v13, %v577_v47  ;;  %v550_v54 = vmul.f32 %v2029_v58, %v519_v14  ;;  %v1577_v58 = vld [vmem:[%s2331_s5 + $0x70] sm:$0xff]  }
 0x157   : > { %v584_v34 = vadd.f32 %v2044_v6, %v553_v12  ;;  %v583_v59 = vadd.f32 %v2041_v5, %v552_v63 }
 0x158   : > { %v582_v15 = vadd.f32 %v2044_v6, %v551_v50  ;;  %v581_v49 = vadd.f32 %v2041_v5, %v550_v54  ;;  %v1576_v6 = vld [vmem:[%s2331_s5 + $0x38] sm:$0xff]   ;;  %v1578_v5 = vld [vmem:[%s2331_s5 + $0x30] sm:$0xff]  }
 0x159   : > { %1474 = vmatpush3.bf16.msra.mxu1 %v1576_v6 }
 0x15a   : > { %v594_v37 = vpack.c.bf16 %v584_v34, %v582_v15  ;;  %v593_v40 = vpack.c.bf16 %v583_v59, %v581_v49  ;;  %1475 = vmatprep.subr.bf16.mxu1 %v1577_v58 }
 0x15c   : > { %852 = vmatmul.mubr.bf16.gmra.mxu0 %v589_v31 }
 0x15d   : > { %861 = vmatprep.mubr.bf16.mxu0 %v592_v33  ;;  %1476 = vmatpush3.bf16.msra.mxu1 %v1578_v5 }
 0x15e   : > { %1477 = vmatprep.subr.bf16.mxu1 %v1579_v41 }
 0x161   : > { %1478 = vmatpush3.bf16.msra.mxu1 %v1580_v42 }
 0x162   : > { %1479 = vmatprep.subr.bf16.mxu1 %v1581_v43 }
 0x164   : > { %862 = vmatmul.mubr.bf16.gmra.mxu0 %v591_v0 }
 0x165   : > { %871 = vmatprep.mubr.bf16.mxu0 %v594_v37  ;;  %1480 = vmatpush3.bf16.msra.mxu1 %v1582_v16 }
 0x166   : > { %1481 = vmatprep.subr.bf16.mxu1 %v1583_v17 }
 0x169   : > { %1482 = vmatpush3.bf16.msra.mxu1 %v1584_v19 }
 0x16a   : > { %1483 = vmatprep.subr.bf16.mxu1 %v1585_v44 }
 0x16c   : > { %872 = vmatmul.mubr.bf16.gmra.mxu0 %v593_v40 }
 0x16d   : > { %1484 = vmatpush3.bf16.msra.mxu1 %v1586_v20 }
 0x16e   : > { %1485 = vmatprep.subr.bf16.mxu1 %v1587_v3 }
 0x171   : > { %1486 = vmatpush3.bf16.msra.mxu1 %v1588_v2 }
 0x172   : > { %1487 = vmatprep.subr.bf16.mxu1 %v1589_v53 }
 0x175   : > { %1488 = vmatpush3.bf16.msra.mxu1 %v1590_v55 }
 0x20c   : > { %v833_v23 = vpop.f32.mrf.mxu0 }
 0x20d   : > { %v834_v25 = vadd.f32 %v833_v23, %v2155_v22 }
 0x20e   : > { %v835_v26 = vpop.f32.mrf.mxu0 }
 0x20f   : > { %v902_v57 = vmul.f32 0.70710677, %v834_v25  ;;  %v836_v29 = vadd.f32 %v835_v26, %v2158_v24  ;;  %v882_v42 = vmul.f32 0.5, %v834_v25 }
 0x210   : > { %v837_v60 = vpop.f32.mrf.mxu0 }
 0x211   : > { %v903_v61 = vmul.f32 0.70710677, %v836_v29  ;;  %v838_v62 = vadd.f32 %v837_v60, %v2155_v22  ;;  %1611 = verf.f32 %v902_v57  ;;  %v883_v46 = vmul.f32 0.5, %v836_v29 }
 0x212   : > { %v839_v1 = vpop.f32.mrf.mxu0 }
 0x213   : > { %v904_v4 = vmul.f32 0.70710677, %v838_v62  ;;  %v840_v45 = vadd.f32 %v839_v1, %v2158_v24  ;;  %1613 = verf.f32 %v903_v61  ;;  %v884_v49 = vmul.f32 0.5, %v838_v62 }
 0x214   : > { %v843_v7 = vpop.f32.mrf.mxu0 }
 0x215   : > { %1615 = verf.f32 %v904_v4  ;;  %v905_v48 = vmul.f32 0.70710677, %v840_v45  ;;  %v844_v10 = vadd.f32 %v843_v7, %v2155_v22  ;;  %v885_v6 = vmul.f32 0.5, %v840_v45 }
 0x216   : > { %v845_v28 = vpop.f32.mrf.mxu0 }
 0x217   : > { %1617 = verf.f32 %v905_v48  ;;  %v906_v11 = vmul.f32 0.70710677, %v844_v10  ;;  %v2166_v18 = vadd.f32 %v845_v28, %v2158_v24  ;;  %v886_v23 = vmul.f32 0.5, %v844_v10 }
 0x218   : > { %v847_v39 = vpop.f32.mrf.mxu0 }
 0x219   : > { %v907_v9 = vmul.f32 0.70710677, %v2166_v18  ;;  %v848_v21 = vadd.f32 %v847_v39, %v2155_v22  ;;  %1619 = verf.f32 %v906_v11  ;;  %v887_v39 = vmul.f32 0.5, %v2166_v18 }
 0x21a   : > { %v849_v36 = vpop.f32.mrf.mxu0 }
 0x21b   : > { %v908_v8 = vmul.f32 0.70710677, %v848_v21  ;;  %v850_v52 = vadd.f32 %v849_v36, %v2158_v24  ;;  %1621 = verf.f32 %v907_v9  ;;  %v888_v45 = vmul.f32 0.5, %v848_v21 }
 0x21c   : > { %v853_v51 = vpop.f32.mrf.mxu0 }
 0x21d   : > { %1623 = verf.f32 %v908_v8  ;;  %v909_v27 = vmul.f32 0.70710677, %v850_v52  ;;  %v2172_v30 = vadd.f32 %v853_v51, %v2155_v22  ;;  %v889_v10 = vmul.f32 0.5, %v850_v52 }
 0x21e   : > { %v855_v31 = vpop.f32.mrf.mxu0  ;;  %v1612_v33 = vpop.eup %1611 }
 0x21f   : > { %1625 = verf.f32 %v909_v27  ;;  %v910_v32 = vmul.f32 0.70710677, %v2172_v30  ;;  %v2176_v12 = vadd.f32 %v855_v31, %v2158_v24  ;;  %v942_v59 = vadd.f32 1.0, %v1612_v33 }
 0x220   : > { %v857_v38 = vpop.f32.mrf.mxu0  ;;  %v1614_v50 = vpop.eup %1613 }
 0x221   : > { %v2179_v13 = vadd.f32 %v857_v38, %v2155_v22  ;;  %v911_v34 = vmul.f32 0.70710677, %v2176_v12  ;;  %1627 = verf.f32 %v910_v32  ;;  %v943_v54 = vadd.f32 1.0, %v1614_v50 }
 0x222   : > { %v1616_v35 = vpop.eup %1615  ;;  %v859_v47 = vpop.f32.mrf.mxu0  ;;  %v962_v2 = vmul.f32 %v942_v59, %v882_v42  ;;  %v891_v59 = vmul.f32 0.5, %v2176_v12 }
 0x223   : > { %v944_v14 = vadd.f32 1.0, %v1616_v35  ;;  %v912_v15 = vmul.f32 0.70710677, %v2179_v13  ;;  %v2184_v0 = vadd.f32 %v859_v47, %v2158_v24  ;;  %1629 = verf.f32 %v911_v34 }
 0x224   : > { %v1618_v63 = vpop.eup %1617  ;;  %v863_v37 = vpop.f32.mrf.mxu0  ;;  %v963_v44 = vmul.f32 %v943_v54, %v883_v46 }
 0x225   : > { %1631 = verf.f32 %v912_v15  ;;  %v913_v40 = vmul.f32 0.70710677, %v2184_v0  ;;  %v2188_v58 = vadd.f32 %v863_v37, %v2155_v22  ;;  %v945_v41 = vadd.f32 1.0, %v1618_v63 }
 0x226   : > { %v865_v5 = vpop.f32.mrf.mxu0  ;;  %v964_v43 = vmul.f32 %v944_v14, %v884_v49  ;;  %v1620_v17 = vpop.eup %1619  ;;  %v892_v49 = vmul.f32 0.5, %v2179_v13 }
 0x227   : > { %1633 = verf.f32 %v913_v40  ;;  %v2191_v16 = vadd.f32 %v865_v5, %v2158_v24  ;;  %v965_v20 = vmul.f32 %v945_v41, %v885_v6  ;;  %v914_v53 = vmul.f32 0.70710677, %v2188_v58 }
 0x228   : > { %v867_v19 = vpop.f32.mrf.mxu0  ;;  %v1622_v3 = vpop.eup %1621  ;;  %v982_v61 = vpack.c.bf16 %v964_v43, %v962_v2  ;;  %v946_v1 = vadd.f32 1.0, %v1620_v17  ;;  %v890_v41 = vmul.f32 0.5, %v2172_v30 }
 0x229   : > { %v915_v55 = vmul.f32 0.70710677, %v2191_v16  ;;  %v2196_v26 = vadd.f32 %v867_v19, %v2155_v22  ;;  %v983_v57 = vpack.c.bf16 %v965_v20, %v963_v44  ;;  %v947_v4 = vadd.f32 1.0, %v1622_v3 }
 0x22a   : > { %v1624_v56 = vpop.eup %1623  ;;  %v869_v25 = vpop.f32.mrf.mxu0  ;;  %v966_v52 = vmul.f32 %v946_v1, %v886_v23 }
 0x22b   : > { %v948_v29 = vadd.f32 1.0, %v1624_v56  ;;  %1635 = verf.f32 %v915_v55  ;;  %v2199_v60 = vadd.f32 %v869_v25, %v2158_v24  ;;  %v916_v7 = vmul.f32 0.70710677, %v2196_v26  ;;  %1159 = vmatprep.mubr.bf16.mxu1 %v983_v57 }
 0x22c   : > { %v1626_v62 = vpop.eup %1625  ;;  %v873_v48 = vpop.f32.mrf.mxu0  ;;  %1637 = verf.f32 %v914_v53  ;;  %1160 = vmatmul.mubr.bf16.vlgmr.msra.gmra.mxu1 %v982_v61  ;;  %v967_v31 = vmul.f32 %v947_v4, %v887_v39  ;;  %v896_v56 = vmul.f32 0.5, %v2196_v26  ;;  %v894_v25 = vmul.f32 0.5, %v2188_v58 }
 0x22d   : > { %v949_v28 = vadd.f32 1.0, %v1626_v62  ;;  %v917_v11 = vmul.f32 0.70710677, %v2199_v60  ;;  %v968_v9 = vmul.f32 %v948_v29, %v888_v45  ;;  %1639 = verf.f32 %v916_v7 }
 0x22e   : > { %v2205_v36 = vadd.f32 %v873_v48, %v2155_v22  ;;  %v875_v8 = vpop.f32.mrf.mxu0  ;;  %v1628_v27 = vpop.eup %1627  ;;  %v897_v30 = vmul.f32 0.5, %v2199_v60 }
 0x22f   : > { %v969_v51 = vmul.f32 %v949_v28, %v889_v10  ;;  %1641 = verf.f32 %v917_v11  ;;  %v2208_v21 = vadd.f32 %v875_v8, %v2158_v24  ;;  %v984_v14 = vpack.c.bf16 %v968_v9, %v966_v52 }
 0x230   : > { %v918_v32 = vmul.f32 0.70710677, %v2205_v36  ;;  %v877_v33 = vpop.f32.mrf.mxu0  ;;  %v1630_v38 = vpop.eup %1629  ;;  %v950_v46 = vadd.f32 1.0, %v1628_v27  ;;  %v898_v9 = vmul.f32 0.5, %v2205_v36 }
 0x231   : > { %v919_v18 = vmul.f32 0.70710677, %v2208_v21  ;;  %v878_v50 = vadd.f32 %v877_v33, %v2155_v22  ;;  %v985_v47 = vpack.c.bf16 %v969_v51, %v967_v31  ;;  %v951_v15 = vadd.f32 1.0, %v1630_v38 }
 0x232   : > { %v1632_v35 = vpop.eup %1631  ;;  %v879_v34 = vpop.f32.mrf.mxu0  ;;  %1643 = verf.f32 %v918_v32  ;;  %v893_v22 = vmul.f32 0.5, %v2184_v0  ;;  %v970_v12 = vmul.f32 %v950_v46, %v890_v41  ;;  %v895_v0 = vmul.f32 0.5, %v2191_v16 }
 0x233   : > { %v952_v63 = vadd.f32 1.0, %v1632_v35  ;;  %v920_v37 = vmul.f32 0.70710677, %v878_v50  ;;  %1645 = verf.f32 %v919_v18  ;;  %v880_v40 = vadd.f32 %v879_v34, %v2158_v24  ;;  %1167 = vmatprep.mubr.bf16.mxu1 %v985_v47  ;;  %v1451_v18 = vld [vmem:[%s2332_s6] ss:$0 sm:$0xff] }
 0x234   : > { %v1634_v54 = vpop.eup %1633  ;;  %1168 = vmatmul.mubr.bf16.gmra.mxu1 %v984_v14  ;;  %v971_v42 = vmul.f32 %v951_v15, %v891_v59  ;;  %v900_v11 = vmul.f32 0.5, %v878_v50  ;;  %v899_v60 = vmul.f32 0.5, %v2208_v21 }
 0x235   : > { %v953_v6 = vadd.f32 1.0, %v1634_v54  ;;  %1647 = verf.f32 %v920_v37  ;;  %v921_v5 = vmul.f32 0.70710677, %v880_v40  ;;  %v972_v43 = vmul.f32 %v952_v63, %v892_v49 }
 0x236   : > { %v901_v39 = vmul.f32 0.5, %v880_v40 }
 0x237   : > { %v973_v17 = vmul.f32 %v953_v6, %v893_v22  ;;  %1649 = verf.f32 %v921_v5  ;;  %v986_v3 = vpack.c.bf16 %v972_v43, %v970_v12 }
 0x238   : > { %v1636_v19 = vpop.eup %1635 }
 0x239   : > { %v987_v13 = vpack.c.bf16 %v973_v17, %v971_v42  ;;  %v1638_v44 = vpop.eup %1637  ;;  %v955_v24 = vadd.f32 1.0, %v1636_v19 }
 0x23a   : > { %v1640_v20 = vpop.eup %1639  ;;  %v954_v55 = vadd.f32 1.0, %v1638_v44 }
 0x23b   : > { %1175 = vmatprep.mubr.bf16.mxu1 %v987_v13  ;;  %v956_v53 = vadd.f32 1.0, %v1640_v20  ;;  %v975_v57 = vmul.f32 %v955_v24, %v895_v0 }
 0x23c   : > { %v1642_v2 = vpop.eup %1641  ;;  %1176 = vmatmul.mubr.bf16.gmra.mxu1 %v986_v3  ;;  %v974_v4 = vmul.f32 %v954_v55, %v894_v25 }
 0x23d   : > { %v957_v23 = vadd.f32 1.0, %v1642_v2  ;;  %v976_v29 = vmul.f32 %v956_v53, %v896_v56 }
 0x23f   : > { %v977_v61 = vmul.f32 %v957_v23, %v897_v30  ;;  %v1644_v62 = vpop.eup %1643  ;;  %v988_v16 = vpack.c.bf16 %v976_v29, %v974_v4 }
 0x240   : > { %v1646_v1 = vpop.eup %1645  ;;  %v958_v26 = vadd.f32 1.0, %v1644_v62 }
 0x241   : > { %v989_v45 = vpack.c.bf16 %v977_v61, %v975_v57  ;;  %v959_v10 = vadd.f32 1.0, %v1646_v1 }
 0x242   : > { %v1648_v7 = vpop.eup %1647  ;;  %v978_v52 = vmul.f32 %v958_v26, %v898_v9 }
 0x243   : > { %v960_v48 = vadd.f32 1.0, %v1648_v7  ;;  %1183 = vmatprep.mubr.bf16.mxu1 %v989_v45  ;;  %v979_v51 = vmul.f32 %v959_v10, %v899_v60 }
 0x244   : > { %v1650_v28 = vpop.eup %1649  ;;  %1184 = vmatmul.mubr.bf16.gmra.mxu1 %v988_v16 }
 0x245   : > { %v961_v58 = vadd.f32 1.0, %v1650_v28  ;;  %v980_v8 = vmul.f32 %v960_v48, %v900_v11 }
 0x247   : > { %v981_v27 = vmul.f32 %v961_v58, %v901_v39  ;;  %v990_v32 = vpack.c.bf16 %v980_v8, %v978_v52 }
 0x249   : > { %v991_v31 = vpack.c.bf16 %v981_v27, %v979_v51 }
 0x24b   : > { %1191 = vmatprep.mubr.bf16.mxu1 %v991_v31 }
 0x24c   : > { %1192 = vmatmul.mubr.bf16.gmra.mxu1 %v990_v32 }
 0x2ec   : > { %v1489_v33 = vpop.f32.mrf.mxu1 }
 0x2ee   : > { %v1490_v38 = vpop.f32.mrf.mxu1 }
 0x2ef   : > { %v1491_v50 = vadd.f32 %v1490_v38, %v1489_v33 }
 0x2f0   : > { %v1492_v21 = vpop.f32.mrf.mxu1 }
 0x2f1   : > { %v1162_v35 = vadd.f32 %v1491_v50, %v1451_v18 }
 0x2f2   : > { %v1493_v34 = vpop.f32.mrf.mxu1 }
 0x2f3   : > { %v1494_v47 = vadd.f32 %v1493_v34, %v1492_v21  ;;  %1202 = vadd.xlane.f32.xlu0 %v1162_v35 }
 0x2f4   : > { %v1495_v36 = vpop.f32.mrf.mxu1 }
 0x2f5   : > { %v1165_v14 = vadd.f32 %v1494_v47, %v1451_v18 }
 0x2f6   : > { %v1496_v15 = vpop.f32.mrf.mxu1 }
 0x2f7   : > { %v1497_v63 = vadd.f32 %v1496_v15, %v1495_v36  ;;  %1204 = vadd.xlane.f32.xlu1 %v1165_v14 }
 0x2f8   : > { %v1498_v37 = vpop.f32.mrf.mxu1 }
 0x2f9   : > { %v1170_v54 = vadd.f32 %v1497_v63, %v1451_v18 }
 0x2fa   : > { %v1499_v59 = vpop.f32.mrf.mxu1 }
 0x2fb   : > { %v1500_v49 = vadd.f32 %v1499_v59, %v1498_v37  ;;  %1206 = vadd.xlane.f32.xlu0 %v1170_v54 }
 0x2fc   : > { %v1501_v40 = vpop.f32.mrf.mxu1 }
 0x2fd   : > { %v1173_v46 = vadd.f32 %v1500_v49, %v1451_v18 }
 0x2fe   : > { %v1502_v22 = vpop.f32.mrf.mxu1 }
 0x2ff   : > { %v1503_v6 = vadd.f32 %v1502_v22, %v1501_v40  ;;  %1208 = vadd.xlane.f32.xlu1 %v1173_v46 }
 0x300   : > { %v1504_v5 = vpop.f32.mrf.mxu1 }
 0x301   : > { %v1178_v41 = vadd.f32 %v1503_v6, %v1451_v18 }
 0x302   : > { %v1505_v42 = vpop.f32.mrf.mxu1 }
 0x303   : > { %v1506_v43 = vadd.f32 %v1505_v42, %v1504_v5  ;;  %1210 = vadd.xlane.f32.xlu0 %v1178_v41 }
 0x304   : > { %v1507_v17 = vpop.f32.mrf.mxu1 }
 0x305   : > { %v1181_v19 = vadd.f32 %v1506_v43, %v1451_v18 }
 0x306   : > { %v1508_v12 = vpop.f32.mrf.mxu1 }
 0x307   : > { %v1509_v13 = vadd.f32 %v1508_v12, %v1507_v17  ;;  %1212 = vadd.xlane.f32.xlu1 %v1181_v19 }
 0x308   : > { %v1510_v44 = vpop.f32.mrf.mxu1 }
 0x309   : > { %v1186_v20 = vadd.f32 %v1509_v13, %v1451_v18 }
 0x30a   : > { %v1511_v24 = vpop.f32.mrf.mxu1 }
 0x30b   : > { %v1512_v3 = vadd.f32 %v1511_v24, %v1510_v44  ;;  %1214 = vadd.xlane.f32.xlu0 %v1186_v20 }
 0x30c   : > { %v1513_v2 = vpop.f32.mrf.mxu1 }
 0x30d   : > { %v1189_v0 = vadd.f32 %v1512_v3, %v1451_v18 }
 0x30e   : > { %v1514_v53 = vpop.f32.mrf.mxu1 }
 0x30f   : > { %v1515_v55 = vadd.f32 %v1514_v53, %v1513_v2  ;;  %1216 = vadd.xlane.f32.xlu1 %v1189_v0  ;;  %v2270_v2 = vld [vmem:[%s2333_s7] ss:$0 sm:$0xff] }
 0x310   : > { %v1516_v56 = vpop.f32.mrf.mxu1 }
 0x311   : > { %v1194_v30 = vadd.f32 %v1515_v55, %v1451_v18  ;;  %v2277_v55 = vld [vmem:[%s2334_s8] ss:$0 sm:$0xff] }
 0x312   : > { %v1517_v23 = vpop.f32.mrf.mxu1 }
 0x313   : > { %v1518_v25 = vadd.f32 %v1517_v23, %v1516_v56  ;;  %1218 = vadd.xlane.f32.xlu0 %v1194_v30 }
 0x315   : > { %v1197_v57 = vadd.f32 %v1518_v25, %v1451_v18 }
 0x317   : > { %1220 = vadd.xlane.f32.xlu1 %v1197_v57 }
 0x37c   : > { %v1203_v29 = vpop.xlane.xlu0 %1202 }
 0x37d   : > { %v1223_v61 = vmul.f32 0.0078125, %v1203_v29 }
 0x37f   : > { %v2227_v62 = vsub.f32 %v1162_v35, %v1223_v61 }
 0x380   : > { %v1205_v1 = vpop.xlane.xlu1 %1204 }
 0x381   : > { %v1224_v4 = vmul.f32 0.0078125, %v1205_v1  ;;  %v1243_v45 = vmul.f32 %v2227_v62, %v2227_v62 }
 0x383   : > { %v2231_v7 = vsub.f32 %v1165_v14, %v1224_v4  ;;  %1253 = vadd.xlane.f32.xlu0 %v1243_v45 }
 0x384   : > { %v1207_v48 = vpop.xlane.xlu0 %1206 }
 0x385   : > { %v1225_v16 = vmul.f32 0.0078125, %v1207_v48  ;;  %v1244_v10 = vmul.f32 %v2231_v7, %v2231_v7 }
 0x387   : > { %v2235_v28 = vsub.f32 %v1170_v54, %v1225_v16  ;;  %1255 = vadd.xlane.f32.xlu1 %v1244_v10 }
 0x388   : > { %v1209_v26 = vpop.xlane.xlu1 %1208 }
 0x389   : > { %v1226_v11 = vmul.f32 0.0078125, %v1209_v26  ;;  %v1245_v60 = vmul.f32 %v2235_v28, %v2235_v28 }
 0x38b   : > { %v2239_v39 = vsub.f32 %v1173_v46, %v1226_v11  ;;  %1257 = vadd.xlane.f32.xlu0 %v1245_v60 }
 0x38c   : > { %v1211_v58 = vpop.xlane.xlu0 %1210 }
 0x38d   : > { %v1227_v9 = vmul.f32 0.0078125, %v1211_v58  ;;  %v1246_v8 = vmul.f32 %v2239_v39, %v2239_v39 }
 0x38f   : > { %v2243_v51 = vsub.f32 %v1178_v41, %v1227_v9  ;;  %1259 = vadd.xlane.f32.xlu1 %v1246_v8 }
 0x390   : > { %v1213_v27 = vpop.xlane.xlu1 %1212 }
 0x391   : > { %v1228_v52 = vmul.f32 0.0078125, %v1213_v27  ;;  %v1247_v31 = vmul.f32 %v2243_v51, %v2243_v51 }
 0x393   : > { %v2247_v32 = vsub.f32 %v1181_v19, %v1228_v52  ;;  %1261 = vadd.xlane.f32.xlu0 %v1247_v31 }
 0x394   : > { %v1215_v33 = vpop.xlane.xlu0 %1214 }
 0x395   : > { %v1229_v38 = vmul.f32 0.0078125, %v1215_v33  ;;  %v1248_v18 = vmul.f32 %v2247_v32, %v2247_v32 }
 0x397   : > { %v2251_v50 = vsub.f32 %v1186_v20, %v1229_v38  ;;  %1263 = vadd.xlane.f32.xlu1 %v1248_v18 }
 0x398   : > { %v1217_v21 = vpop.xlane.xlu1 %1216 }
 0x399   : > { %v1230_v35 = vmul.f32 0.0078125, %v1217_v21  ;;  %v1249_v34 = vmul.f32 %v2251_v50, %v2251_v50 }
 0x39b   : > { %v2255_v47 = vsub.f32 %v1189_v0, %v1230_v35  ;;  %1265 = vadd.xlane.f32.xlu0 %v1249_v34 }
 0x39c   : > { %v1219_v36 = vpop.xlane.xlu0 %1218 }
 0x39d   : > { %v1231_v14 = vmul.f32 0.0078125, %v1219_v36  ;;  %v1250_v15 = vmul.f32 %v2255_v47, %v2255_v47 }
 0x39f   : > { %v2259_v63 = vsub.f32 %v1194_v30, %v1231_v14  ;;  %1267 = vadd.xlane.f32.xlu1 %v1250_v15 }
 0x3a0   : > { %v1221_v37 = vpop.xlane.xlu1 %1220 }
 0x3a1   : > { %v1232_v54 = vmul.f32 0.0078125, %v1221_v37  ;;  %v1251_v59 = vmul.f32 %v2259_v63, %v2259_v63 }
 0x3a3   : > { %v2263_v49 = vsub.f32 %v1197_v57, %v1232_v54  ;;  %1269 = vadd.xlane.f32.xlu0 %v1251_v59 }
 0x3a5   : > { %v1252_v40 = vmul.f32 %v2263_v49, %v2263_v49 }
 0x3a7   : > { %1271 = vadd.xlane.f32.xlu1 %v1252_v40 }
 0x40c   : > { %v1254_v46 = vpop.xlane.xlu0 %1253 }
 0x40d   : > { %v1273_v22 = vmul.f32 0.0078125, %v1254_v46 }
 0x40f   : > { %v1283_v6 = vadd.f32 1e-05, %v1273_v22 }
 0x410   : > { %v1256_v5 = vpop.xlane.xlu1 %1255 }
 0x411   : > { %1651 = vrsqrt.f32 %v1283_v6  ;;  %v1274_v41 = vmul.f32 0.0078125, %v1256_v5 }
 0x413   : > { %v1284_v42 = vadd.f32 1e-05, %v1274_v41 }
 0x414   : > { %v1258_v43 = vpop.xlane.xlu0 %1257 }
 0x415   : > { %1653 = vrsqrt.f32 %v1284_v42  ;;  %v1275_v17 = vmul.f32 0.0078125, %v1258_v43 }
 0x417   : > { %v1285_v19 = vadd.f32 1e-05, %v1275_v17 }
 0x418   : > { %v1260_v12 = vpop.xlane.xlu1 %1259 }
 0x419   : > { %1655 = vrsqrt.f32 %v1285_v19  ;;  %v1276_v13 = vmul.f32 0.0078125, %v1260_v12 }
 0x41b   : > { %v1286_v44 = vadd.f32 1e-05, %v1276_v13 }
 0x41c   : > { %v1262_v20 = vpop.xlane.xlu0 %1261 }
 0x41d   : > { %1657 = vrsqrt.f32 %v1286_v44  ;;  %v1277_v24 = vmul.f32 0.0078125, %v1262_v20 }
 0x41e   : > { %v1652_v3 = vpop.eup %1651 }
 0x41f   : > { %v1303_v0 = vmul.f32 %v1652_v3, %v2227_v62  ;;  %v1287_v53 = vadd.f32 1e-05, %v1277_v24 }
 0x420   : > { %v1264_v56 = vpop.xlane.xlu1 %1263 }
 0x421   : > { %v1319_v30 = vmul.f32 %v2270_v2, %v1303_v0  ;;  %1659 = vrsqrt.f32 %v1287_v53  ;;  %v1278_v23 = vmul.f32 0.0078125, %v1264_v56 }
 0x422   : > { %v1654_v25 = vpop.eup %1653 }
 0x423   : > { %v1335_v57 = vadd.f32 %v2277_v55, %v1319_v30  ;;  %v1304_v29 = vmul.f32 %v1654_v25, %v2231_v7  ;;  %v1288_v61 = vadd.f32 1e-05, %v1278_v23 }
 0x424   : > { %v1266_v62 = vpop.xlane.xlu0 %1265 }
 0x425   : > { %1345 = vst [vmem:[%s2283_s13] sm:$0xff] %v1335_v57  ;;  %v1320_v1 = vmul.f32 %v2270_v2, %v1304_v29  ;;  %1661 = vrsqrt.f32 %v1288_v61  ;;  %v1279_v4 = vmul.f32 0.0078125, %v1266_v62 }
 0x426   : > { %v1656_v45 = vpop.eup %1655 }
 0x427   : > { %v1336_v48 = vadd.f32 %v2277_v55, %v1320_v1  ;;  %v1305_v16 = vmul.f32 %v1656_v45, %v2235_v28  ;;  %v1289_v10 = vadd.f32 1e-05, %v1279_v4 }
 0x428   : > { %v1268_v26 = vpop.xlane.xlu1 %1267 }
 0x429   : > { %1346 = vst [vmem:[%s2283_s13 + $0x8] sm:$0xff] %v1336_v48  ;;  %v1321_v11 = vmul.f32 %v2270_v2, %v1305_v16  ;;  %1663 = vrsqrt.f32 %v1289_v10  ;;  %v1280_v7 = vmul.f32 0.0078125, %v1268_v26 }
 0x42a   : > { %v1658_v60 = vpop.eup %1657 }
 0x42b   : > { %v1337_v58 = vadd.f32 %v2277_v55, %v1321_v11  ;;  %v1306_v9 = vmul.f32 %v1658_v60, %v2239_v39  ;;  %v1290_v8 = vadd.f32 1e-05, %v1280_v7 }
 0x42c   : > { %v1270_v27 = vpop.xlane.xlu0 %1269 }
 0x42d   : > { %1347 = vst [vmem:[%s2283_s13 + $0x10] sm:$0xff] %v1337_v58  ;;  %v1322_v52 = vmul.f32 %v2270_v2, %v1306_v9  ;;  %1665 = vrsqrt.f32 %v1290_v8  ;;  %v1281_v28 = vmul.f32 0.0078125, %v1270_v27 }
 0x42e   : > { %v1660_v31 = vpop.eup %1659 }
 0x42f   : > { %v1338_v33 = vadd.f32 %v2277_v55, %v1322_v52  ;;  %v1307_v38 = vmul.f32 %v1660_v31, %v2243_v51  ;;  %v1291_v18 = vadd.f32 1e-05, %v1281_v28 }
 0x430   : > { %v1272_v21 = vpop.xlane.xlu1 %1271 }
 0x431   : > { %1348 = vst [vmem:[%s2283_s13 + $0x18] sm:$0xff] %v1338_v33  ;;  %v1323_v35 = vmul.f32 %v2270_v2, %v1307_v38  ;;  %1667 = vrsqrt.f32 %v1291_v18  ;;  %v1282_v39 = vmul.f32 0.0078125, %v1272_v21 }
 0x432   : > { %v1662_v34 = vpop.eup %1661 }
 0x433   : > { %v1339_v36 = vadd.f32 %v2277_v55, %v1323_v35  ;;  %v1308_v14 = vmul.f32 %v1662_v34, %v2247_v32  ;;  %v1292_v15 = vadd.f32 1e-05, %v1282_v39 }
 0x435   : > { %1349 = vst [vmem:[%s2283_s13 + $0x20] sm:$0xff] %v1339_v36  ;;  %v1324_v37 = vmul.f32 %v2270_v2, %v1308_v14  ;;  %1669 = vrsqrt.f32 %v1292_v15 }
 0x436   : > { %v1664_v51 = vpop.eup %1663 }
 0x437   : > { %v1340_v54 = vadd.f32 %v2277_v55, %v1324_v37  ;;  %v1309_v59 = vmul.f32 %v1664_v51, %v2251_v50 }
 0x439   : > { %1350 = vst [vmem:[%s2283_s13 + $0x28] sm:$0xff] %v1340_v54  ;;  %v1325_v40 = vmul.f32 %v2270_v2, %v1309_v59 }
 0x43a   : > { %v1666_v46 = vpop.eup %1665 }
 0x43b   : > { %v1341_v22 = vadd.f32 %v2277_v55, %v1325_v40  ;;  %v1310_v32 = vmul.f32 %v1666_v46, %v2255_v47 }
 0x43d   : > { %1351 = vst [vmem:[%s2283_s13 + $0x30] sm:$0xff] %v1341_v22  ;;  %v1326_v6 = vmul.f32 %v2270_v2, %v1310_v32 }
 0x43e   : > { %v1668_v5 = vpop.eup %1667 }
 0x43f   : > { %v1342_v41 = vadd.f32 %v2277_v55, %v1326_v6  ;;  %v1311_v42 = vmul.f32 %v1668_v5, %v2259_v63 }
 0x441   : > { %1352 = vst [vmem:[%s2283_s13 + $0x38] sm:$0xff] %v1342_v41  ;;  %v1327_v50 = vmul.f32 %v2270_v2, %v1311_v42 }
 0x442   : > { %v1670_v43 = vpop.eup %1669 }
 0x443   : > { %v1343_v17 = vadd.f32 %v2277_v55, %v1327_v50  ;;  %v1312_v19 = vmul.f32 %v1670_v43, %v2263_v49 }
 0x445   : > { %1353 = vst [vmem:[%s2283_s13 + $0x40] sm:$0xff] %v1343_v17  ;;  %v1328_v12 = vmul.f32 %v2270_v2, %v1312_v19 }
 0x447   : > { %v1344_v47 = vadd.f32 %v2277_v55, %v1328_v12 }
 0x449   : > { %1354 = vst [vmem:[%s2283_s13 + $0x48] sm:$0xff] %v1344_v47 }
 0x44a PF: > { %s19_s30 = sadd.s32 1, %s1677_s30  }
 0x44b   : > { %p16_p4 = scmp.ge.s32.totalorder %s19_s30, 4  }
 0x44d   :  { %18 = sbr.rel (!%p16_p4) target bundleno = 1 (0x1), region = 86 }

</bundles_post_ra>
